<compile_context>
chip_gen: v7x
topology: tpu7x:2x2x1
jax: 0.10.0
libtpu: 0.0.40
codegen_flags: <defaults>
</compile_context>

<pallas_src>
import jax
import jax.numpy as jnp
from jax import lax
from jax.experimental import pallas as pl
from jax.experimental.pallas import tpu as pltpu


# --------------------------- fused Pallas kernel -----------------------------

def _gs_bottleneck_kernel(x_ref, m1_ref, bsc_ref, b1_ref,
                          mdw1_ref, db1_ref, m2_ref, b2_ref,
                          mdw2_ref, db2_ref, o_ref,
                          xp_ref, g1p_ref, g2p_ref):
    # Per grid step (one batch element), folded lane layout (lane = w*Cch + c):
    #   x_ref   : (1, H, W*C)
    #   m1_ref  : (3, W*C,  W*C + W*C2)  -- [shortcut | GSCONV1 conv], one mat per kh
    #   mdw1_ref: (3, W*C2, W*C2)        -- GSCONV1 depthwise (c1 slots -> d1 slots)
    #   m2_ref  : (3, W*C2, W*C)         -- GSCONV2 conv (g1 -> c2 slots)
    #   mdw2_ref: (3, W*C,  W*C)         -- GSCONV2 depthwise (c2 slots -> d2 slots)
    #   biases  : (1, N) spread into the same folded layouts
    #   o_ref   : (1, H, W*C)            -- lane-dense output slab
    _, H, WC = x_ref.shape
    WC2 = g1p_ref.shape[1]
    f32 = jnp.float32

    # ---- stage 0: H-halo pad of the input, border rows only ------------------
    zc = jnp.zeros((1, WC), f32)
    xp_ref[0:1, :] = zc
    xp_ref[H + 1:H + 2, :] = zc
    xp_ref[1:H + 1, :] = x_ref[0].astype(f32)

    # ---- stage A: [shortcut | GSCONV1 3x3 conv] as 3 folded matmuls ----------
    acc = jnp.dot(xp_ref[0:H, :], m1_ref[0], preferred_element_type=f32)
    acc += jnp.dot(xp_ref[1:H + 1, :], m1_ref[1], preferred_element_type=f32)
    acc += jnp.dot(xp_ref[2:H + 2, :], m1_ref[2], preferred_element_type=f32)
    sc = jnp.maximum(acc[:, :WC] + bsc_ref[...], 0.0)        # (H, W*C)
    c1 = jnp.maximum(acc[:, WC:] + b1_ref[...], 0.0)         # (H, W*C2), d1 slots = 0

    # ---- stage B: GSCONV1 depthwise 3x3 as 3 folded matmuls ------------------
    zc2 = jnp.zeros((1, WC2), f32)
    g1p_ref[0:1, :] = zc2
    g1p_ref[H + 1:H + 2, :] = zc2
    g1p_ref[1:H + 1, :] = c1
    d1 = jnp.dot(g1p_ref[0:H, :], mdw1_ref[0], preferred_element_type=f32)
    d1 += jnp.dot(g1p_ref[1:H + 1, :], mdw1_ref[1], preferred_element_type=f32)
    d1 += jnp.dot(g1p_ref[2:H + 2, :], mdw1_ref[2], preferred_element_type=f32)
    d1 = jnp.maximum(d1 + db1_ref[...], 0.0)                  # c1 slots = 0
    g1p_ref[1:H + 1, :] = c1 + d1          # g1 = concat([c1, d1]) via disjoint slots

    # ---- stage C: GSCONV2 3x3 conv as 3 folded matmuls -----------------------
    g2p_ref[0:1, :] = zc
    g2p_ref[H + 1:H + 2, :] = zc
    c2 = jnp.dot(g1p_ref[0:H, :], m2_ref[0], preferred_element_type=f32)
    c2 += jnp.dot(g1p_ref[1:H + 1, :], m2_ref[1], preferred_element_type=f32)
    c2 += jnp.dot(g1p_ref[2:H + 2, :], m2_ref[2], preferred_element_type=f32)
    c2 = jnp.maximum(c2 + b2_ref[...], 0.0)                   # (H, W*C), d2 slots = 0
    g2p_ref[1:H + 1, :] = c2

    # ---- stage D: GSCONV2 depthwise + concat + residual in one dense store ---
    d2 = jnp.dot(g2p_ref[0:H, :], mdw2_ref[0], preferred_element_type=f32)
    d2 += jnp.dot(g2p_ref[1:H + 1, :], mdw2_ref[1], preferred_element_type=f32)
    d2 += jnp.dot(g2p_ref[2:H + 2, :], mdw2_ref[2], preferred_element_type=f32)
    d2 = jnp.maximum(d2 + db2_ref[...], 0.0)                   # c2 slots = 0
    o_ref[0] = (c2 + d2 + sc).astype(o_ref.dtype)              # unmasked 128-lane stores


# --------------------------- wrapper ------------------------------------------

def _place_conv(M, w_kh, W, s_in, s_out, col_base, col_off):
    """Scatter one kh-row of a conv weight (KW, Cin, Cout) into a folded banded matrix.

    M[w_in*s_in + ci, col_base + w_out*s_out + col_off + co] = w_kh[kw, ci, co]
    with w_in = w_out + kw - KW//2 (out-of-range w_in dropped == zero W padding).
    """
    KW, Cin, Cout = w_kh.shape
    half = KW // 2
    for wo in range(W):
        for kw in range(KW):
            wi = wo + kw - half
            if 0 <= wi < W:
                r0 = wi * s_in
                c0 = col_base + wo * s_out + col_off
                M = M.at[r0:r0 + Cin, c0:c0 + Cout].set(w_kh[kw])
    return M


def gs_bottleneck(x_nchw, p):
    """GSBottleneck.forward. x_nchw: (B, C, H, W) -> (B, C, H, W)."""
    B, C, H, W = x_nchw.shape
    C2, C4 = C // 2, C // 4
    WC, WC2 = W * C, W * C2
    f32 = jnp.float32

    # NCHW -> lane-dense folded slab (B, H, W*C); lane index = w*C + c (XLA glue).
    x = jnp.transpose(x_nchw, (0, 2, 3, 1)).reshape(B, H, WC)

    # ---- trace-time folded banded weight matrices -----------------------------
    w1 = p['w1'].astype(f32)                     # (3,3,C,C4)   HWIO
    w2 = p['w2'].astype(f32)                     # (3,3,C2,C2)
    ws = p['ws'].astype(f32)                     # (C,C) 1x1
    dw1 = p['dw1'][:, :, 0, :].astype(f32)       # (3,3,C4)
    dw2 = p['dw2'][:, :, 0, :].astype(f32)       # (3,3,C2)
    dw1_dense = dw1[..., :, None] * jnp.eye(C4, dtype=f32)   # (3,3,C4,C4) diagonal
    dw2_dense = dw2[..., :, None] * jnp.eye(C2, dtype=f32)   # (3,3,C2,C2) diagonal

    m1, mdw1, m2, mdw2 = [], [], [], []
    for kh in range(3):
        # Fused [shortcut | GSCONV1 conv] along N; shortcut only at the center kh.
        M = jnp.zeros((WC, WC + WC2), f32)
        M = _place_conv(M, w1[kh], W, C, C2, WC, 0)           # c1 into g1-layout slots
        if kh == 1:
            M = _place_conv(M, ws[None], W, C, C, 0, 0)       # 1x1 shortcut, block-diag
        m1.append(M)
        # GSCONV1 depthwise: read c1 slots, write d1 slots of the g1 layout.
        mdw1.append(_place_conv(jnp.zeros((WC2, WC2), f32), dw1_dense[kh], W, C2, C2, 0, C4))
        # GSCONV2 conv: g1 layout -> c2 slots of the (W*C) layout.
        m2.append(_place_conv(jnp.zeros((WC2, WC), f32), w2[kh], W, C2, C, 0, 0))
        # GSCONV2 depthwise: read c2 slots, write d2 slots of the (W*C) layout.
        mdw2.append(_place_conv(jnp.zeros((WC, WC), f32), dw2_dense[kh], W, C, C, 0, C2))
    m1, mdw1, m2, mdw2 = map(jnp.stack, (m1, mdw1, m2, mdw2))

    # Biases spread into the folded lane layouts (zeros in the other half's slots).
    bsc = jnp.tile(p['bs'].astype(f32), (W,)).reshape(1, WC)
    b1s = jnp.tile(jnp.concatenate([p['b1'].astype(f32), jnp.zeros((C4,), f32)]),
                   (W,)).reshape(1, WC2)
    db1s = jnp.tile(jnp.concatenate([jnp.zeros((C4,), f32), p['db1'].astype(f32)]),
                    (W,)).reshape(1, WC2)
    b2s = jnp.tile(jnp.concatenate([p['b2'].astype(f32), jnp.zeros((C2,), f32)]),
                   (W,)).reshape(1, WC)
    db2s = jnp.tile(jnp.concatenate([jnp.zeros((C2,), f32), p['db2'].astype(f32)]),
                    (W,)).reshape(1, WC)

    def full_spec(a):
        return pl.BlockSpec(a.shape, lambda i, _z=(0,) * a.ndim: _z)

    out = pl.pallas_call(
        _gs_bottleneck_kernel,
        out_shape=jax.ShapeDtypeStruct((B, H, WC), x_nchw.dtype),
        grid=(B,),
        in_specs=[
            pl.BlockSpec((1, H, WC), lambda i: (i, 0, 0)),
            full_spec(m1), full_spec(bsc), full_spec(b1s),
            full_spec(mdw1), full_spec(db1s),
            full_spec(m2), full_spec(b2s),
            full_spec(mdw2), full_spec(db2s),
        ],
        out_specs=pl.BlockSpec((1, H, WC), lambda i: (i, 0, 0)),
        scratch_shapes=[
            pltpu.VMEM((H + 2, WC), jnp.float32),    # H-halo padded x
            pltpu.VMEM((H + 2, WC2), jnp.float32),   # H-halo padded g1 (c1|d1 slots)
            pltpu.VMEM((H + 2, WC), jnp.float32),    # H-halo padded c2
        ],
        compiler_params=pltpu.CompilerParams(
            dimension_semantics=("parallel",),
            vmem_limit_bytes=32 * 1024 * 1024),
    )(x, m1, bsc, b1s, mdw1, db1s, m2, b2s, mdw2, db2s)

    out = out.reshape(B, H, W, C)
    return jnp.transpose(out, (0, 3, 1, 2))          # folded NHWC slab -> NCHW (glue)


# --------------------------- pure-JAX reference ------------------------------

def gs_bottleneck_ref(x_nchw, p):
    x = jnp.transpose(x_nchw, (0, 2, 3, 1))

    def conv(x, w, b, pad):
        y = lax.conv_general_dilated(x, w, (1, 1), ((pad, pad), (pad, pad)),
                                     dimension_numbers=('NHWC', 'HWIO', 'NHWC'))
        return jax.nn.relu(y + b)

    def dwconv(x, w, b):
        c = x.shape[-1]
        y = lax.conv_general_dilated(x, w, (1, 1), ((1, 1), (1, 1)),
                                     dimension_numbers=('NHWC', 'HWIO', 'NHWC'),
                                     feature_group_count=c)
        return jax.nn.relu(y + b)

    sc = conv(x, p['ws'].reshape(1, 1, *p['ws'].shape), p['bs'], 0)
    c1 = conv(x, p['w1'], p['b1'], 1)
    d1 = dwconv(c1, p['dw1'], p['db1'])
    g1 = jnp.concatenate([c1, d1], axis=-1)
    c2 = conv(g1, p['w2'], p['b2'], 1)
    d2 = dwconv(c2, p['dw2'], p['db2'])
    g2 = jnp.concatenate([c2, d2], axis=-1)
    return jnp.transpose(g2 + sc, (0, 3, 1, 2))


# --------------------------- main ---------------------------------------------

if __name__ == "__main__":
    B, C, H, W = 2, 8, 16, 16            # channels_num = 8 (divisible by 4); W*C = 128
    key = jax.random.PRNGKey(0)
    kx, *kw = jax.random.split(key, 11)
    x = jax.random.normal(kx, (B, C, H, W), jnp.float32)

    s = 0.2
    params = {
        # GSCONV1: CONV(C -> C//4, 3x3, pad 1, bias, relu)
        'w1':  jax.random.normal(kw[0], (3, 3, C, C // 4), jnp.float32) * s,
        'b1':  jax.random.normal(kw[1], (C // 4,), jnp.float32) * s,
        # GSCONV1: DWCONV(C//4, 3x3, pad 1, bias, relu)
        'dw1': jax.random.normal(kw[2], (3, 3, 1, C // 4), jnp.float32) * s,
        'db1': jax.random.normal(kw[3], (C // 4,), jnp.float32) * s,
        # GSCONV2: CONV(C//2 -> C//2, 3x3, pad 1, bias, relu)
        'w2':  jax.random.normal(kw[4], (3, 3, C // 2, C // 2), jnp.float32) * s,
        'b2':  jax.random.normal(kw[5], (C // 2,), jnp.float32) * s,
        # GSCONV2: DWCONV(C//2, 3x3, pad 1, bias, relu)
        'dw2': jax.random.normal(kw[6], (3, 3, 1, C // 2), jnp.float32) * s,
        'db2': jax.random.normal(kw[7], (C // 2,), jnp.float32) * s,
        # shortcut: CONV(C -> C, 1x1, bias, relu)
        'ws':  jax.random.normal(kw[8], (C, C), jnp.float32) * s,
        'bs':  jax.random.normal(kw[9], (C,), jnp.float32) * s,
    }

    out = jax.block_until_ready(jax.jit(gs_bottleneck)(x, params))
    ref = jax.block_until_ready(gs_bottleneck_ref(x, params))

    assert out.shape == (B, C, H, W)
    assert jnp.allclose(out, ref, atol=2e-4, rtol=2e-4), "Pallas output mismatch vs reference"
    print("KERNEL_OK")
</pallas_src>

<mosaic_0001>
module attributes {stable_mosaic.version = 11 : i64} {
  func.func @_gs_bottleneck_kernel(%arg0: i32, %arg1: memref<1x16x128xf32, #tpu.memory_space<vmem>>, %arg2: memref<3x128x192xf32, #tpu.memory_space<vmem>>, %arg3: memref<1x128xf32, #tpu.memory_space<vmem>>, %arg4: memref<1x64xf32, #tpu.memory_space<vmem>>, %arg5: memref<3x64x64xf32, #tpu.memory_space<vmem>>, %arg6: memref<1x64xf32, #tpu.memory_space<vmem>>, %arg7: memref<3x64x128xf32, #tpu.memory_space<vmem>>, %arg8: memref<1x128xf32, #tpu.memory_space<vmem>>, %arg9: memref<3x128x128xf32, #tpu.memory_space<vmem>>, %arg10: memref<1x128xf32, #tpu.memory_space<vmem>>, %arg11: memref<1x16x128xf32, #tpu.memory_space<vmem>>, %arg12: memref<18x128xf32, #tpu.memory_space<vmem>>, %arg13: memref<18x64xf32, #tpu.memory_space<vmem>>, %arg14: memref<18x128xf32, #tpu.memory_space<vmem>>) attributes {dimension_semantics = [#tpu.dimension_semantics<parallel>], iteration_bounds = array<i64: 2>, scalar_prefetch = 0 : i64, scratch_operands = 3 : i64, tpu.core_type = #tpu.core_type<tc>, window_params = [{transform_indices = @transform_0, window_bounds = array<i64: 1, 16, 128>}, {pipeline_mode = #tpu.pipeline_mode<synchronous>, transform_indices = @transform_1, window_bounds = array<i64: 3, 128, 192>}, {pipeline_mode = #tpu.pipeline_mode<synchronous>, transform_indices = @transform_2, window_bounds = array<i64: 1, 128>}, {pipeline_mode = #tpu.pipeline_mode<synchronous>, transform_indices = @transform_3, window_bounds = array<i64: 1, 64>}, {pipeline_mode = #tpu.pipeline_mode<synchronous>, transform_indices = @transform_4, window_bounds = array<i64: 3, 64, 64>}, {pipeline_mode = #tpu.pipeline_mode<synchronous>, transform_indices = @transform_5, window_bounds = array<i64: 1, 64>}, {pipeline_mode = #tpu.pipeline_mode<synchronous>, transform_indices = @transform_6, window_bounds = array<i64: 3, 64, 128>}, {pipeline_mode = #tpu.pipeline_mode<synchronous>, transform_indices = @transform_7, window_bounds = array<i64: 1, 128>}, {pipeline_mode = #tpu.pipeline_mode<synchronous>, transform_indices = @transform_8, window_bounds = array<i64: 3, 128, 128>}, {pipeline_mode = #tpu.pipeline_mode<synchronous>, transform_indices = @transform_9, window_bounds = array<i64: 1, 128>}, {transform_indices = @transform_10, window_bounds = array<i64: 1, 16, 128>}]} {
    %cst = arith.constant 0.000000e+00 : f32
    %0 = vector.broadcast %cst : f32 to vector<1x128xf32>
    %c0 = arith.constant 0 : index
    %c0_0 = arith.constant 0 : index
    %1 = vector.load %arg12[%c0, %c0_0] : memref<18x128xf32, #tpu.memory_space<vmem>>, vector<1x128xf32>
    tpu.vector_store %arg12[%c0, %c0_0], %0 {strides = array<i32>} : memref<18x128xf32, #tpu.memory_space<vmem>>, vector<1x128xf32>,
    %c17 = arith.constant 17 : index
    %c0_1 = arith.constant 0 : index
    %2 = vector.load %arg12[%c17, %c0_1] : memref<18x128xf32, #tpu.memory_space<vmem>>, vector<1x128xf32>
    tpu.vector_store %arg12[%c17, %c0_1], %0 {strides = array<i32>} : memref<18x128xf32, #tpu.memory_space<vmem>>, vector<1x128xf32>,
    %c0_2 = arith.constant 0 : index
    %c0_3 = arith.constant 0 : index
    %c0_4 = arith.constant 0 : index
    %3 = vector.load %arg1[%c0_2, %c0_3, %c0_4] : memref<1x16x128xf32, #tpu.memory_space<vmem>>, vector<1x16x128xf32>
    %4 = vector.shape_cast %3 : vector<1x16x128xf32> to vector<16x128xf32>
    %c1 = arith.constant 1 : index
    %c0_5 = arith.constant 0 : index
    %5 = vector.load %arg12[%c1, %c0_5] : memref<18x128xf32, #tpu.memory_space<vmem>>, vector<16x128xf32>
    tpu.vector_store %arg12[%c1, %c0_5], %4 {strides = array<i32>} : memref<18x128xf32, #tpu.memory_space<vmem>>, vector<16x128xf32>,
    %c0_6 = arith.constant 0 : index
    %c0_7 = arith.constant 0 : index
    %6 = vector.load %arg12[%c0_6, %c0_7] : memref<18x128xf32, #tpu.memory_space<vmem>>, vector<16x128xf32>
    %c0_8 = arith.constant 0 : index
    %c0_9 = arith.constant 0 : index
    %c0_10 = arith.constant 0 : index
    %7 = vector.load %arg2[%c0_8, %c0_9, %c0_10] : memref<3x128x192xf32, #tpu.memory_space<vmem>>, vector<1x128x192xf32>
    %8 = vector.shape_cast %7 : vector<1x128x192xf32> to vector<128x192xf32>
    %cst_11 = arith.constant dense<0.000000e+00> : vector<16x192xf32>
    %9 = tpu.matmul %6, %8, %cst_11 {dimension_numbers = #tpu.dot_dimension_numbers<[1], [0], [0], [1], [0, 0, 1, 1], [], []>} : vector<16x128xf32>, vector<128x192xf32>, vector<16x192xf32> -> vector<16x192xf32>
    %c1_12 = arith.constant 1 : index
    %c0_13 = arith.constant 0 : index
    %10 = vector.load %arg12[%c1_12, %c0_13] : memref<18x128xf32, #tpu.memory_space<vmem>>, vector<16x128xf32>
    %c1_14 = arith.constant 1 : index
    %c0_15 = arith.constant 0 : index
    %c0_16 = arith.constant 0 : index
    %11 = vector.load %arg2[%c1_14, %c0_15, %c0_16] : memref<3x128x192xf32, #tpu.memory_space<vmem>>, vector<1x128x192xf32>
    %12 = vector.shape_cast %11 : vector<1x128x192xf32> to vector<128x192xf32>
    %cst_17 = arith.constant dense<0.000000e+00> : vector<16x192xf32>
    %13 = tpu.matmul %10, %12, %cst_17 {dimension_numbers = #tpu.dot_dimension_numbers<[1], [0], [0], [1], [0, 0, 1, 1], [], []>} : vector<16x128xf32>, vector<128x192xf32>, vector<16x192xf32> -> vector<16x192xf32>
    %14 = arith.addf %9, %13 : vector<16x192xf32>
    %c2 = arith.constant 2 : index
    %c0_18 = arith.constant 0 : index
    %15 = vector.load %arg12[%c2, %c0_18] : memref<18x128xf32, #tpu.memory_space<vmem>>, vector<16x128xf32>
    %c2_19 = arith.constant 2 : index
    %c0_20 = arith.constant 0 : index
    %c0_21 = arith.constant 0 : index
    %16 = vector.load %arg2[%c2_19, %c0_20, %c0_21] : memref<3x128x192xf32, #tpu.memory_space<vmem>>, vector<1x128x192xf32>
    %17 = vector.shape_cast %16 : vector<1x128x192xf32> to vector<128x192xf32>
    %cst_22 = arith.constant dense<0.000000e+00> : vector<16x192xf32>
    %18 = tpu.matmul %15, %17, %cst_22 {dimension_numbers = #tpu.dot_dimension_numbers<[1], [0], [0], [1], [0, 0, 1, 1], [], []>} : vector<16x128xf32>, vector<128x192xf32>, vector<16x192xf32> -> vector<16x192xf32>
    %19 = arith.addf %14, %18 : vector<16x192xf32>
    %20 = vector.extract_strided_slice %19 {offsets = [0, 0], sizes = [16, 128], strides = [1, 1]} : vector<16x192xf32> to vector<16x128xf32>
    %c0_23 = arith.constant 0 : index
    %c0_24 = arith.constant 0 : index
    %21 = vector.load %arg3[%c0_23, %c0_24] : memref<1x128xf32, #tpu.memory_space<vmem>>, vector<1x128xf32>
    %22 = vector.broadcast %21 : vector<1x128xf32> to vector<16x128xf32>
    %23 = arith.addf %20, %22 : vector<16x128xf32>
    %cst_25 = arith.constant 0.000000e+00 : f32
    %24 = vector.broadcast %cst_25 : f32 to vector<16x128xf32>
    %25 = arith.maximumf %23, %24 : vector<16x128xf32>
    %26 = vector.extract_strided_slice %19 {offsets = [0, 128], sizes = [16, 64], strides = [1, 1]} : vector<16x192xf32> to vector<16x64xf32>
    %c0_26 = arith.constant 0 : index
    %c0_27 = arith.constant 0 : index
    %27 = vector.load %arg4[%c0_26, %c0_27] : memref<1x64xf32, #tpu.memory_space<vmem>>, vector<1x64xf32>
    %28 = vector.broadcast %27 : vector<1x64xf32> to vector<16x64xf32>
    %29 = arith.addf %26, %28 : vector<16x64xf32>
    %cst_28 = arith.constant 0.000000e+00 : f32
    %30 = vector.broadcast %cst_28 : f32 to vector<16x64xf32>
    %31 = arith.maximumf %29, %30 : vector<16x64xf32>
    %cst_29 = arith.constant 0.000000e+00 : f32
    %32 = vector.broadcast %cst_29 : f32 to vector<1x64xf32>
    %c0_30 = arith.constant 0 : index
    %c0_31 = arith.constant 0 : index
    %33 = vector.load %arg13[%c0_30, %c0_31] : memref<18x64xf32, #tpu.memory_space<vmem>>, vector<1x64xf32>
    tpu.vector_store %arg13[%c0_30, %c0_31], %32 {strides = array<i32>} : memref<18x64xf32, #tpu.memory_space<vmem>>, vector<1x64xf32>,
    %c17_32 = arith.constant 17 : index
    %c0_33 = arith.constant 0 : index
    %34 = vector.load %arg13[%c17_32, %c0_33] : memref<18x64xf32, #tpu.memory_space<vmem>>, vector<1x64xf32>
    tpu.vector_store %arg13[%c17_32, %c0_33], %32 {strides = array<i32>} : memref<18x64xf32, #tpu.memory_space<vmem>>, vector<1x64xf32>,
    %c1_34 = arith.constant 1 : index
    %c0_35 = arith.constant 0 : index
    %35 = vector.load %arg13[%c1_34, %c0_35] : memref<18x64xf32, #tpu.memory_space<vmem>>, vector<16x64xf32>
    tpu.vector_store %arg13[%c1_34, %c0_35], %31 {strides = array<i32>} : memref<18x64xf32, #tpu.memory_space<vmem>>, vector<16x64xf32>,
    %c0_36 = arith.constant 0 : index
    %c0_37 = arith.constant 0 : index
    %36 = vector.load %arg13[%c0_36, %c0_37] : memref<18x64xf32, #tpu.memory_space<vmem>>, vector<16x64xf32>
    %c0_38 = arith.constant 0 : index
    %c0_39 = arith.constant 0 : index
    %c0_40 = arith.constant 0 : index
    %37 = vector.load %arg5[%c0_38, %c0_39, %c0_40] : memref<3x64x64xf32, #tpu.memory_space<vmem>>, vector<1x64x64xf32>
    %38 = vector.shape_cast %37 : vector<1x64x64xf32> to vector<64x64xf32>
    %cst_41 = arith.constant dense<0.000000e+00> : vector<16x64xf32>
    %39 = tpu.matmul %36, %38, %cst_41 {dimension_numbers = #tpu.dot_dimension_numbers<[1], [0], [0], [1], [0, 0, 1, 1], [], []>} : vector<16x64xf32>, vector<64x64xf32>, vector<16x64xf32> -> vector<16x64xf32>
    %c1_42 = arith.constant 1 : index
    %c0_43 = arith.constant 0 : index
    %40 = vector.load %arg13[%c1_42, %c0_43] : memref<18x64xf32, #tpu.memory_space<vmem>>, vector<16x64xf32>
    %c1_44 = arith.constant 1 : index
    %c0_45 = arith.constant 0 : index
    %c0_46 = arith.constant 0 : index
    %41 = vector.load %arg5[%c1_44, %c0_45, %c0_46] : memref<3x64x64xf32, #tpu.memory_space<vmem>>, vector<1x64x64xf32>
    %42 = vector.shape_cast %41 : vector<1x64x64xf32> to vector<64x64xf32>
    %cst_47 = arith.constant dense<0.000000e+00> : vector<16x64xf32>
    %43 = tpu.matmul %40, %42, %cst_47 {dimension_numbers = #tpu.dot_dimension_numbers<[1], [0], [0], [1], [0, 0, 1, 1], [], []>} : vector<16x64xf32>, vector<64x64xf32>, vector<16x64xf32> -> vector<16x64xf32>
    %44 = arith.addf %39, %43 : vector<16x64xf32>
    %c2_48 = arith.constant 2 : index
    %c0_49 = arith.constant 0 : index
    %45 = vector.load %arg13[%c2_48, %c0_49] : memref<18x64xf32, #tpu.memory_space<vmem>>, vector<16x64xf32>
    %c2_50 = arith.constant 2 : index
    %c0_51 = arith.constant 0 : index
    %c0_52 = arith.constant 0 : index
    %46 = vector.load %arg5[%c2_50, %c0_51, %c0_52] : memref<3x64x64xf32, #tpu.memory_space<vmem>>, vector<1x64x64xf32>
    %47 = vector.shape_cast %46 : vector<1x64x64xf32> to vector<64x64xf32>
    %cst_53 = arith.constant dense<0.000000e+00> : vector<16x64xf32>
    %48 = tpu.matmul %45, %47, %cst_53 {dimension_numbers = #tpu.dot_dimension_numbers<[1], [0], [0], [1], [0, 0, 1, 1], [], []>} : vector<16x64xf32>, vector<64x64xf32>, vector<16x64xf32> -> vector<16x64xf32>
    %49 = arith.addf %44, %48 : vector<16x64xf32>
    %c0_54 = arith.constant 0 : index
    %c0_55 = arith.constant 0 : index
    %50 = vector.load %arg6[%c0_54, %c0_55] : memref<1x64xf32, #tpu.memory_space<vmem>>, vector<1x64xf32>
    %51 = vector.broadcast %50 : vector<1x64xf32> to vector<16x64xf32>
    %52 = arith.addf %49, %51 : vector<16x64xf32>
    %cst_56 = arith.constant 0.000000e+00 : f32
    %53 = vector.broadcast %cst_56 : f32 to vector<16x64xf32>
    %54 = arith.maximumf %52, %53 : vector<16x64xf32>
    %55 = arith.addf %31, %54 : vector<16x64xf32>
    %c1_57 = arith.constant 1 : index
    %c0_58 = arith.constant 0 : index
    %56 = vector.load %arg13[%c1_57, %c0_58] : memref<18x64xf32, #tpu.memory_space<vmem>>, vector<16x64xf32>
    tpu.vector_store %arg13[%c1_57, %c0_58], %55 {strides = array<i32>} : memref<18x64xf32, #tpu.memory_space<vmem>>, vector<16x64xf32>,
    %c0_59 = arith.constant 0 : index
    %c0_60 = arith.constant 0 : index
    %57 = vector.load %arg14[%c0_59, %c0_60] : memref<18x128xf32, #tpu.memory_space<vmem>>, vector<1x128xf32>
    tpu.vector_store %arg14[%c0_59, %c0_60], %0 {strides = array<i32>} : memref<18x128xf32, #tpu.memory_space<vmem>>, vector<1x128xf32>,
    %c17_61 = arith.constant 17 : index
    %c0_62 = arith.constant 0 : index
    %58 = vector.load %arg14[%c17_61, %c0_62] : memref<18x128xf32, #tpu.memory_space<vmem>>, vector<1x128xf32>
    tpu.vector_store %arg14[%c17_61, %c0_62], %0 {strides = array<i32>} : memref<18x128xf32, #tpu.memory_space<vmem>>, vector<1x128xf32>,
    %c0_63 = arith.constant 0 : index
    %c0_64 = arith.constant 0 : index
    %59 = vector.load %arg13[%c0_63, %c0_64] : memref<18x64xf32, #tpu.memory_space<vmem>>, vector<16x64xf32>
    %c0_65 = arith.constant 0 : index
    %c0_66 = arith.constant 0 : index
    %c0_67 = arith.constant 0 : index
    %60 = vector.load %arg7[%c0_65, %c0_66, %c0_67] : memref<3x64x128xf32, #tpu.memory_space<vmem>>, vector<1x64x128xf32>
    %61 = vector.shape_cast %60 : vector<1x64x128xf32> to vector<64x128xf32>
    %cst_68 = arith.constant dense<0.000000e+00> : vector<16x128xf32>
    %62 = tpu.matmul %59, %61, %cst_68 {dimension_numbers = #tpu.dot_dimension_numbers<[1], [0], [0], [1], [0, 0, 1, 1], [], []>} : vector<16x64xf32>, vector<64x128xf32>, vector<16x128xf32> -> vector<16x128xf32>
    %c1_69 = arith.constant 1 : index
    %c0_70 = arith.constant 0 : index
    %63 = vector.load %arg13[%c1_69, %c0_70] : memref<18x64xf32, #tpu.memory_space<vmem>>, vector<16x64xf32>
    %c1_71 = arith.constant 1 : index
    %c0_72 = arith.constant 0 : index
    %c0_73 = arith.constant 0 : index
    %64 = vector.load %arg7[%c1_71, %c0_72, %c0_73] : memref<3x64x128xf32, #tpu.memory_space<vmem>>, vector<1x64x128xf32>
    %65 = vector.shape_cast %64 : vector<1x64x128xf32> to vector<64x128xf32>
    %cst_74 = arith.constant dense<0.000000e+00> : vector<16x128xf32>
    %66 = tpu.matmul %63, %65, %cst_74 {dimension_numbers = #tpu.dot_dimension_numbers<[1], [0], [0], [1], [0, 0, 1, 1], [], []>} : vector<16x64xf32>, vector<64x128xf32>, vector<16x128xf32> -> vector<16x128xf32>
    %67 = arith.addf %62, %66 : vector<16x128xf32>
    %c2_75 = arith.constant 2 : index
    %c0_76 = arith.constant 0 : index
    %68 = vector.load %arg13[%c2_75, %c0_76] : memref<18x64xf32, #tpu.memory_space<vmem>>, vector<16x64xf32>
    %c2_77 = arith.constant 2 : index
    %c0_78 = arith.constant 0 : index
    %c0_79 = arith.constant 0 : index
    %69 = vector.load %arg7[%c2_77, %c0_78, %c0_79] : memref<3x64x128xf32, #tpu.memory_space<vmem>>, vector<1x64x128xf32>
    %70 = vector.shape_cast %69 : vector<1x64x128xf32> to vector<64x128xf32>
    %cst_80 = arith.constant dense<0.000000e+00> : vector<16x128xf32>
    %71 = tpu.matmul %68, %70, %cst_80 {dimension_numbers = #tpu.dot_dimension_numbers<[1], [0], [0], [1], [0, 0, 1, 1], [], []>} : vector<16x64xf32>, vector<64x128xf32>, vector<16x128xf32> -> vector<16x128xf32>
    %72 = arith.addf %67, %71 : vector<16x128xf32>
    %c0_81 = arith.constant 0 : index
    %c0_82 = arith.constant 0 : index
    %73 = vector.load %arg8[%c0_81, %c0_82] : memref<1x128xf32, #tpu.memory_space<vmem>>, vector<1x128xf32>
    %74 = vector.broadcast %73 : vector<1x128xf32> to vector<16x128xf32>
    %75 = arith.addf %72, %74 : vector<16x128xf32>
    %cst_83 = arith.constant 0.000000e+00 : f32
    %76 = vector.broadcast %cst_83 : f32 to vector<16x128xf32>
    %77 = arith.maximumf %75, %76 : vector<16x128xf32>
    %c1_84 = arith.constant 1 : index
    %c0_85 = arith.constant 0 : index
    %78 = vector.load %arg14[%c1_84, %c0_85] : memref<18x128xf32, #tpu.memory_space<vmem>>, vector<16x128xf32>
    tpu.vector_store %arg14[%c1_84, %c0_85], %77 {strides = array<i32>} : memref<18x128xf32, #tpu.memory_space<vmem>>, vector<16x128xf32>,
    %c0_86 = arith.constant 0 : index
    %c0_87 = arith.constant 0 : index
    %79 = vector.load %arg14[%c0_86, %c0_87] : memref<18x128xf32, #tpu.memory_space<vmem>>, vector<16x128xf32>
    %c0_88 = arith.constant 0 : index
    %c0_89 = arith.constant 0 : index
    %c0_90 = arith.constant 0 : index
    %80 = vector.load %arg9[%c0_88, %c0_89, %c0_90] : memref<3x128x128xf32, #tpu.memory_space<vmem>>, vector<1x128x128xf32>
    %81 = vector.shape_cast %80 : vector<1x128x128xf32> to vector<128x128xf32>
    %cst_91 = arith.constant dense<0.000000e+00> : vector<16x128xf32>
    %82 = tpu.matmul %79, %81, %cst_91 {dimension_numbers = #tpu.dot_dimension_numbers<[1], [0], [0], [1], [0, 0, 1, 1], [], []>} : vector<16x128xf32>, vector<128x128xf32>, vector<16x128xf32> -> vector<16x128xf32>
    %c1_92 = arith.constant 1 : index
    %c0_93 = arith.constant 0 : index
    %83 = vector.load %arg14[%c1_92, %c0_93] : memref<18x128xf32, #tpu.memory_space<vmem>>, vector<16x128xf32>
    %c1_94 = arith.constant 1 : index
    %c0_95 = arith.constant 0 : index
    %c0_96 = arith.constant 0 : index
    %84 = vector.load %arg9[%c1_94, %c0_95, %c0_96] : memref<3x128x128xf32, #tpu.memory_space<vmem>>, vector<1x128x128xf32>
    %85 = vector.shape_cast %84 : vector<1x128x128xf32> to vector<128x128xf32>
    %cst_97 = arith.constant dense<0.000000e+00> : vector<16x128xf32>
    %86 = tpu.matmul %83, %85, %cst_97 {dimension_numbers = #tpu.dot_dimension_numbers<[1], [0], [0], [1], [0, 0, 1, 1], [], []>} : vector<16x128xf32>, vector<128x128xf32>, vector<16x128xf32> -> vector<16x128xf32>
    %87 = arith.addf %82, %86 : vector<16x128xf32>
    %c2_98 = arith.constant 2 : index
    %c0_99 = arith.constant 0 : index
    %88 = vector.load %arg14[%c2_98, %c0_99] : memref<18x128xf32, #tpu.memory_space<vmem>>, vector<16x128xf32>
    %c2_100 = arith.constant 2 : index
    %c0_101 = arith.constant 0 : index
    %c0_102 = arith.constant 0 : index
    %89 = vector.load %arg9[%c2_100, %c0_101, %c0_102] : memref<3x128x128xf32, #tpu.memory_space<vmem>>, vector<1x128x128xf32>
    %90 = vector.shape_cast %89 : vector<1x128x128xf32> to vector<128x128xf32>
    %cst_103 = arith.constant dense<0.000000e+00> : vector<16x128xf32>
    %91 = tpu.matmul %88, %90, %cst_103 {dimension_numbers = #tpu.dot_dimension_numbers<[1], [0], [0], [1], [0, 0, 1, 1], [], []>} : vector<16x128xf32>, vector<128x128xf32>, vector<16x128xf32> -> vector<16x128xf32>
    %92 = arith.addf %87, %91 : vector<16x128xf32>
    %c0_104 = arith.constant 0 : index
    %c0_105 = arith.constant 0 : index
    %93 = vector.load %arg10[%c0_104, %c0_105] : memref<1x128xf32, #tpu.memory_space<vmem>>, vector<1x128xf32>
    %94 = vector.broadcast %93 : vector<1x128xf32> to vector<16x128xf32>
    %95 = arith.addf %92, %94 : vector<16x128xf32>
    %cst_106 = arith.constant 0.000000e+00 : f32
    %96 = vector.broadcast %cst_106 : f32 to vector<16x128xf32>
    %97 = arith.maximumf %95, %96 : vector<16x128xf32>
    %98 = arith.addf %77, %97 : vector<16x128xf32>
    %99 = arith.addf %98, %25 : vector<16x128xf32>
    %c0_107 = arith.constant 0 : index
    %c0_108 = arith.constant 0 : index
    %c0_109 = arith.constant 0 : index
    %100 = vector.load %arg11[%c0_107, %c0_108, %c0_109] : memref<1x16x128xf32, #tpu.memory_space<vmem>>, vector<1x16x128xf32>
    %101 = vector.shape_cast %100 : vector<1x16x128xf32> to vector<16x128xf32>
    %102 = vector.shape_cast %99 : vector<16x128xf32> to vector<1x16x128xf32>
    tpu.vector_store %arg11[%c0_107, %c0_108, %c0_109], %102 {strides = array<i32>} : memref<1x16x128xf32, #tpu.memory_space<vmem>>, vector<1x16x128xf32>,
    return
  }
  func.func @transform_0(%arg0: i32) -> (i32, i32, i32) {
    %c0_i32 = arith.constant 0 : i32
    %c0_i32_0 = arith.constant 0 : i32
    %c0_i32_1 = arith.constant 0 : i32
    return %arg0, %c0_i32, %c0_i32_0 : i32, i32, i32
  }
  func.func @transform_1(%arg0: i32) -> (i32, i32, i32) {
    %c0_i32 = arith.constant 0 : i32
    %c0_i32_0 = arith.constant 0 : i32
    %c0_i32_1 = arith.constant 0 : i32
    %c0_i32_2 = arith.constant 0 : i32
    return %c0_i32, %c0_i32_0, %c0_i32_1 : i32, i32, i32
  }
  func.func @transform_2(%arg0: i32) -> (i32, i32) {
    %c0_i32 = arith.constant 0 : i32
    %c0_i32_0 = arith.constant 0 : i32
    %c0_i32_1 = arith.constant 0 : i32
    return %c0_i32, %c0_i32_0 : i32, i32
  }
  func.func @transform_3(%arg0: i32) -> (i32, i32) {
    %c0_i32 = arith.constant 0 : i32
    %c0_i32_0 = arith.constant 0 : i32
    %c0_i32_1 = arith.constant 0 : i32
    return %c0_i32, %c0_i32_0 : i32, i32
  }
  func.func @transform_4(%arg0: i32) -> (i32, i32, i32) {
    %c0_i32 = arith.constant 0 : i32
    %c0_i32_0 = arith.constant 0 : i32
    %c0_i32_1 = arith.constant 0 : i32
    %c0_i32_2 = arith.constant 0 : i32
    return %c0_i32, %c0_i32_0, %c0_i32_1 : i32, i32, i32
  }
  func.func @transform_5(%arg0: i32) -> (i32, i32) {
    %c0_i32 = arith.constant 0 : i32
    %c0_i32_0 = arith.constant 0 : i32
    %c0_i32_1 = arith.constant 0 : i32
    return %c0_i32, %c0_i32_0 : i32, i32
  }
  func.func @transform_6(%arg0: i32) -> (i32, i32, i32) {
    %c0_i32 = arith.constant 0 : i32
    %c0_i32_0 = arith.constant 0 : i32
    %c0_i32_1 = arith.constant 0 : i32
    %c0_i32_2 = arith.constant 0 : i32
    return %c0_i32, %c0_i32_0, %c0_i32_1 : i32, i32, i32
  }
  func.func @transform_7(%arg0: i32) -> (i32, i32) {
    %c0_i32 = arith.constant 0 : i32
    %c0_i32_0 = arith.constant 0 : i32
    %c0_i32_1 = arith.constant 0 : i32
    return %c0_i32, %c0_i32_0 : i32, i32
  }
  func.func @transform_8(%arg0: i32) -> (i32, i32, i32) {
    %c0_i32 = arith.constant 0 : i32
    %c0_i32_0 = arith.constant 0 : i32
    %c0_i32_1 = arith.constant 0 : i32
    %c0_i32_2 = arith.constant 0 : i32
    return %c0_i32, %c0_i32_0, %c0_i32_1 : i32, i32, i32
  }
  func.func @transform_9(%arg0: i32) -> (i32, i32) {
    %c0_i32 = arith.constant 0 : i32
    %c0_i32_0 = arith.constant 0 : i32
    %c0_i32_1 = arith.constant 0 : i32
    return %c0_i32, %c0_i32_0 : i32, i32
  }
  func.func @transform_10(%arg0: i32) -> (i32, i32, i32) {
    %c0_i32 = arith.constant 0 : i32
    %c0_i32_0 = arith.constant 0 : i32
    %c0_i32_1 = arith.constant 0 : i32
    return %arg0, %c0_i32, %c0_i32_0 : i32, i32, i32
  }
}

</mosaic_0001>

<bundles_post_ra>
// kernel: tile.33
= control target key start
LH: loop header
LB: loop body
LE: loop exit
PB: predicated region body
PF: predicated region fallthrough
CT: control target
= control target key end

     0   :  { %s28_s0 = inlined_call_operand.vmem [shape: f32[4], index: 0, kind: input, shape index: {}]   ;;  %s29_s1 = inlined_call_operand.vmem [shape: f32[16,4], index: 1, kind: output, shape index: {}]  }
   0x1   :  { %v4_v0 = vld [vmem:[%s28_s0] ss:$0 sm:$0xff] }
   0x2   :  { %5 = vst [vmem:[%s29_s1] sm:$0xff] %v4_v0  ;;  %8 = vst [vmem:[%s29_s1 + $0x8] sm:$0xff] %v4_v0 }

// kernel: tile.34
= control target key start
LH: loop header
LB: loop body
LE: loop exit
PB: predicated region body
PF: predicated region fallthrough
CT: control target
= control target key end

     0   :  { %s131_s10 = smov 60   ;;  %s132_s11 = smov 52   ;;  %vm3_vm0 = vcmask 31744   ;;  %vm9_vm1 = vcmask 523744   ;;  %vm15_vm2 = vcmask 490944   ;;  %vm21_vm3 = vcmask 458144   ;;  %s207_s0 = inlined_call_operand.vmem [shape: f32[16,4], index: 0, kind: input, shape index: {}]   ;;  %s208_s1 = inlined_call_operand.vmem [shape: f32[1,64], index: 1, kind: output, shape index: {}]  }
   0x1   :  { %v101_v0 = vld [vmem:[%s207_s0 + $0xf] sm:$0x1]   ;;  %v103_v1 = vld [vmem:[%s207_s0 + $0xd] sm:$0x1]   ;;  %v102_v2 = vld [vmem:[%s207_s0 + $0xe] sm:$0x1]  }
   0x2   :  { %7 = vrot.lane.b32.xlu0 %v101_v0, %s131_s10  ;;  %19 = vrot.lane.b32.xlu1 %v103_v1, %s132_s11  ;;  %v104_v3 = vld [vmem:[%s207_s0 + $0xc] sm:$0x1]   ;;  %s133_s16 = smov 56   ;;  %s134_s17 = smov 48   ;;  %v105_v4 = vld [vmem:[%s207_s0 + $0xb] sm:$0x1]  }
   0x3   :  { %v106_v5 = vld [vmem:[%s207_s0 + $0xa] sm:$0x1]   ;;  %v2_v6 = vld [vmem:[%s207_s0] sm:$0x1]   ;;  %s135_s24 = smov 44   ;;  %s136_s25 = smov 40  }
   0x4   :  { %4 = vst.msk [vmem:[#allocation0] sm:$0x1] %vm3_vm0, %v2_v6   ;;  %v107_v7 = vld [vmem:[%s207_s0 + $0x9] sm:$0x1]   ;;  %v108_v8 = vld [vmem:[%s207_s0 + $0x8] sm:$0x1]  }
   0x5   :  { %s137_s30 = smov 36   ;;  %s138_s2 = smov 32   ;;  %v109_v9 = vld [vmem:[%s207_s0 + $0x7] sm:$0x1]   ;;  %v110_v10 = vld [vmem:[%s207_s0 + $0x6] sm:$0x1]  }
   0x6   :  { %13 = vrot.lane.b32.xlu0 %v102_v2, %s133_s16  ;;  %25 = vrot.lane.b32.xlu1 %v104_v3, %s134_s17  ;;  %s139_s7 = smov 28   ;;  %s140_s8 = smov 24   ;;  %v111_v11 = vld [vmem:[%s207_s0 + $0x5] sm:$0x1]   ;;  %v112_v12 = vld [vmem:[%s207_s0 + $0x4] sm:$0x1]  }
   0x7   :  { %s141_s13 = smov 20   ;;  %s142_s14 = smov 16   ;;  %v113_v13 = vld [vmem:[%s207_s0 + $0x3] sm:$0x1]   ;;  %v114_v14 = vld [vmem:[%s207_s0 + $0x2] sm:$0x1]  }
   0x8   :  { %s143_s19 = smov 12   ;;  %s144_s20 = smov 8   ;;  %v115_v15 = vld [vmem:[%s207_s0 + $0x1] sm:$0x1]   ;;  %vm27_vm4 = vcmask 425344   ;;  %vm33_vm5 = vcmask 392544  }
   0x9   :  { %s145_s0 = smov 4   ;;  %vm39_vm6 = vcmask 359744   ;;  %vm45_vm7 = vcmask 326944   ;;  %vm51_vm8 = vcmask 294144   ;;  %vm57_vm9 = vcmask 261344  }
   0xa   :  { %31 = vrot.lane.b32.xlu0 %v105_v4, %s135_s24  ;;  %37 = vrot.lane.b32.xlu1 %v106_v5, %s136_s25  ;;  %vm63_vm10 = vcmask 228544   ;;  %vm69_vm11 = vcmask 195744   ;;  %vm75_vm12 = vcmask 162944   ;;  %vm81_vm13 = vcmask 130144  }
   0xb   :  { %vm87_vm14 = vcmask 97344   ;;  %vm93_vm15 = vcmask 64544  }
   0xe   :  { %43 = vrot.lane.b32.xlu0 %v107_v7, %s137_s30  ;;  %49 = vrot.lane.b32.xlu1 %v108_v8, %s138_s2 }
  0x12   :  { %55 = vrot.lane.b32.xlu0 %v109_v9, %s139_s7  ;;  %61 = vrot.lane.b32.xlu1 %v110_v10, %s140_s8 }
  0x16   :  { %67 = vrot.lane.b32.xlu0 %v111_v11, %s141_s13  ;;  %73 = vrot.lane.b32.xlu1 %v112_v12, %s142_s14 }
  0x1a   :  { %79 = vrot.lane.b32.xlu0 %v113_v13, %s143_s19  ;;  %85 = vrot.lane.b32.xlu1 %v114_v14, %s144_s20 }
  0x1e   :  { %91 = vrot.lane.b32.xlu0 %v115_v15, %s145_s0 }
  0x74   :  { %v8_v16 = vpop.permute.xlu0 %7   ;;  %v20_v17 = vpop.permute.xlu1 %19  }
  0x75   :  { %10 = vst.msk [vmem:[#allocation0] sm:$0x1] %vm9_vm1, %v8_v16  }
  0x78   :  { %v14_v18 = vpop.permute.xlu0 %13   ;;  %v26_v19 = vpop.permute.xlu1 %25  }
  0x79   :  { %16 = vst.msk [vmem:[#allocation0] sm:$0x1] %vm15_vm2, %v14_v18  }
  0x7a   :  { %22 = vst.msk [vmem:[#allocation0] sm:$0x1] %vm21_vm3, %v20_v17  }
  0x7b   :  { %28 = vst.msk [vmem:[#allocation0] sm:$0x1] %vm27_vm4, %v26_v19  }
  0x7c   :  { %v32_v20 = vpop.permute.xlu0 %31   ;;  %v38_v21 = vpop.permute.xlu1 %37  }
  0x7d   :  { %34 = vst.msk [vmem:[#allocation0] sm:$0x1] %vm33_vm5, %v32_v20  }
  0x7e   :  { %40 = vst.msk [vmem:[#allocation0] sm:$0x1] %vm39_vm6, %v38_v21  }
  0x80   :  { %v44_v22 = vpop.permute.xlu0 %43   ;;  %v50_v23 = vpop.permute.xlu1 %49  }
  0x81   :  { %46 = vst.msk [vmem:[#allocation0] sm:$0x1] %vm45_vm7, %v44_v22  }
  0x82   :  { %52 = vst.msk [vmem:[#allocation0] sm:$0x1] %vm51_vm8, %v50_v23  }
  0x84   :  { %v56_v24 = vpop.permute.xlu0 %55   ;;  %v62_v25 = vpop.permute.xlu1 %61  }
  0x85   :  { %58 = vst.msk [vmem:[#allocation0] sm:$0x1] %vm57_vm9, %v56_v24  }
  0x86   :  { %64 = vst.msk [vmem:[#allocation0] sm:$0x1] %vm63_vm10, %v62_v25  }
  0x88   :  { %v68_v26 = vpop.permute.xlu0 %67   ;;  %v74_v27 = vpop.permute.xlu1 %73  }
  0x89   :  { %70 = vst.msk [vmem:[#allocation0] sm:$0x1] %vm69_vm11, %v68_v26  }
  0x8a   :  { %76 = vst.msk [vmem:[#allocation0] sm:$0x1] %vm75_vm12, %v74_v27  }
  0x8c   :  { %v80_v28 = vpop.permute.xlu0 %79   ;;  %v86_v29 = vpop.permute.xlu1 %85  }
  0x8d   :  { %82 = vst.msk [vmem:[#allocation0] sm:$0x1] %vm81_vm13, %v80_v28  }
  0x8e   :  { %88 = vst.msk [vmem:[#allocation0] sm:$0x1] %vm87_vm14, %v86_v29  }
  0x90   :  { %v92_v30 = vpop.permute.xlu0 %91  }
  0x91   :  { %94 = vst.msk [vmem:[#allocation0] sm:$0x1] %vm93_vm15, %v92_v30  }
  0x98   :  { %v98_v31 = vld [vmem:[#allocation0] sm:$0x1] }
  0x99   :  { %100 = vst [vmem:[%s208_s1] sm:$0x1] %v98_v31 }

// kernel: tile.43
= control target key start
LH: loop header
LB: loop body
LE: loop exit
PB: predicated region body
PF: predicated region fallthrough
CT: control target
= control target key end

     0   :  { %s28_s0 = inlined_call_operand.vmem [shape: f32[8], index: 0, kind: input, shape index: {}]   ;;  %s29_s1 = inlined_call_operand.vmem [shape: f32[16,8], index: 1, kind: output, shape index: {}]  }
   0x1   :  { %v4_v0 = vld [vmem:[%s28_s0] ss:$0 sm:$0xff] }
   0x2   :  { %5 = vst [vmem:[%s29_s1] sm:$0xff] %v4_v0  ;;  %8 = vst [vmem:[%s29_s1 + $0x8] sm:$0xff] %v4_v0 }

// kernel: tile.44
= control target key start
LH: loop header
LB: loop body
LE: loop exit
PB: predicated region body
PF: predicated region fallthrough
CT: control target
= control target key end

     0   :  { %s131_s10 = smov 120   ;;  %s132_s11 = smov 104   ;;  %vm3_vm0 = vcmask 64512   ;;  %vm9_vm1 = vcmask 1048512   ;;  %vm15_vm2 = vcmask 982912   ;;  %vm21_vm3 = vcmask 917312   ;;  %s207_s0 = inlined_call_operand.vmem [shape: f32[16,8], index: 0, kind: input, shape index: {}]   ;;  %s208_s1 = inlined_call_operand.vmem [shape: f32[1,128], index: 1, kind: output, shape index: {}]  }
   0x1   :  { %v101_v0 = vld [vmem:[%s207_s0 + $0xf] sm:$0x1]   ;;  %v103_v1 = vld [vmem:[%s207_s0 + $0xd] sm:$0x1]   ;;  %v102_v2 = vld [vmem:[%s207_s0 + $0xe] sm:$0x1]  }
   0x2   :  { %7 = vrot.lane.b32.xlu0 %v101_v0, %s131_s10  ;;  %19 = vrot.lane.b32.xlu1 %v103_v1, %s132_s11  ;;  %v104_v3 = vld [vmem:[%s207_s0 + $0xc] sm:$0x1]   ;;  %s133_s16 = smov 112   ;;  %s134_s17 = smov 96   ;;  %v105_v4 = vld [vmem:[%s207_s0 + $0xb] sm:$0x1]  }
   0x3   :  { %v106_v5 = vld [vmem:[%s207_s0 + $0xa] sm:$0x1]   ;;  %v2_v6 = vld [vmem:[%s207_s0] sm:$0x1]   ;;  %s135_s24 = smov 88   ;;  %s136_s25 = smov 80  }
   0x4   :  { %4 = vst.msk [vmem:[#allocation0] sm:$0x1] %vm3_vm0, %v2_v6   ;;  %v107_v7 = vld [vmem:[%s207_s0 + $0x9] sm:$0x1]   ;;  %v108_v8 = vld [vmem:[%s207_s0 + $0x8] sm:$0x1]  }
   0x5   :  { %s137_s30 = smov 72   ;;  %s138_s2 = smov 64   ;;  %v109_v9 = vld [vmem:[%s207_s0 + $0x7] sm:$0x1]   ;;  %v110_v10 = vld [vmem:[%s207_s0 + $0x6] sm:$0x1]  }
   0x6   :  { %13 = vrot.lane.b32.xlu0 %v102_v2, %s133_s16  ;;  %25 = vrot.lane.b32.xlu1 %v104_v3, %s134_s17  ;;  %s139_s7 = smov 56   ;;  %s140_s8 = smov 48   ;;  %v111_v11 = vld [vmem:[%s207_s0 + $0x5] sm:$0x1]   ;;  %v112_v12 = vld [vmem:[%s207_s0 + $0x4] sm:$0x1]  }
   0x7   :  { %s141_s13 = smov 40   ;;  %s142_s14 = smov 32   ;;  %v113_v13 = vld [vmem:[%s207_s0 + $0x3] sm:$0x1]   ;;  %v114_v14 = vld [vmem:[%s207_s0 + $0x2] sm:$0x1]  }
   0x8   :  { %s143_s19 = smov 24   ;;  %s144_s20 = smov 16   ;;  %v115_v15 = vld [vmem:[%s207_s0 + $0x1] sm:$0x1]   ;;  %vm27_vm4 = vcmask 851712   ;;  %vm33_vm5 = vcmask 786112  }
   0x9   :  { %s145_s0 = smov 8   ;;  %vm39_vm6 = vcmask 720512   ;;  %vm45_vm7 = vcmask 654912   ;;  %vm51_vm8 = vcmask 589312   ;;  %vm57_vm9 = vcmask 523712  }
   0xa   :  { %31 = vrot.lane.b32.xlu0 %v105_v4, %s135_s24  ;;  %37 = vrot.lane.b32.xlu1 %v106_v5, %s136_s25  ;;  %vm63_vm10 = vcmask 458112   ;;  %vm69_vm11 = vcmask 392512   ;;  %vm75_vm12 = vcmask 326912   ;;  %vm81_vm13 = vcmask 261312  }
   0xb   :  { %vm87_vm14 = vcmask 195712   ;;  %vm93_vm15 = vcmask 130112  }
   0xe   :  { %43 = vrot.lane.b32.xlu0 %v107_v7, %s137_s30  ;;  %49 = vrot.lane.b32.xlu1 %v108_v8, %s138_s2 }
  0x12   :  { %55 = vrot.lane.b32.xlu0 %v109_v9, %s139_s7  ;;  %61 = vrot.lane.b32.xlu1 %v110_v10, %s140_s8 }
  0x16   :  { %67 = vrot.lane.b32.xlu0 %v111_v11, %s141_s13  ;;  %73 = vrot.lane.b32.xlu1 %v112_v12, %s142_s14 }
  0x1a   :  { %79 = vrot.lane.b32.xlu0 %v113_v13, %s143_s19  ;;  %85 = vrot.lane.b32.xlu1 %v114_v14, %s144_s20 }
  0x1e   :  { %91 = vrot.lane.b32.xlu0 %v115_v15, %s145_s0 }
  0x74   :  { %v8_v16 = vpop.permute.xlu0 %7   ;;  %v20_v17 = vpop.permute.xlu1 %19  }
  0x75   :  { %10 = vst.msk [vmem:[#allocation0] sm:$0x1] %vm9_vm1, %v8_v16  }
  0x78   :  { %v14_v18 = vpop.permute.xlu0 %13   ;;  %v26_v19 = vpop.permute.xlu1 %25  }
  0x79   :  { %16 = vst.msk [vmem:[#allocation0] sm:$0x1] %vm15_vm2, %v14_v18  }
  0x7a   :  { %22 = vst.msk [vmem:[#allocation0] sm:$0x1] %vm21_vm3, %v20_v17  }
  0x7b   :  { %28 = vst.msk [vmem:[#allocation0] sm:$0x1] %vm27_vm4, %v26_v19  }
  0x7c   :  { %v32_v20 = vpop.permute.xlu0 %31   ;;  %v38_v21 = vpop.permute.xlu1 %37  }
  0x7d   :  { %34 = vst.msk [vmem:[#allocation0] sm:$0x1] %vm33_vm5, %v32_v20  }
  0x7e   :  { %40 = vst.msk [vmem:[#allocation0] sm:$0x1] %vm39_vm6, %v38_v21  }
  0x80   :  { %v44_v22 = vpop.permute.xlu0 %43   ;;  %v50_v23 = vpop.permute.xlu1 %49  }
  0x81   :  { %46 = vst.msk [vmem:[#allocation0] sm:$0x1] %vm45_vm7, %v44_v22  }
  0x82   :  { %52 = vst.msk [vmem:[#allocation0] sm:$0x1] %vm51_vm8, %v50_v23  }
  0x84   :  { %v56_v24 = vpop.permute.xlu0 %55   ;;  %v62_v25 = vpop.permute.xlu1 %61  }
  0x85   :  { %58 = vst.msk [vmem:[#allocation0] sm:$0x1] %vm57_vm9, %v56_v24  }
  0x86   :  { %64 = vst.msk [vmem:[#allocation0] sm:$0x1] %vm63_vm10, %v62_v25  }
  0x88   :  { %v68_v26 = vpop.permute.xlu0 %67   ;;  %v74_v27 = vpop.permute.xlu1 %73  }
  0x89   :  { %70 = vst.msk [vmem:[#allocation0] sm:$0x1] %vm69_vm11, %v68_v26  }
  0x8a   :  { %76 = vst.msk [vmem:[#allocation0] sm:$0x1] %vm75_vm12, %v74_v27  }
  0x8c   :  { %v80_v28 = vpop.permute.xlu0 %79   ;;  %v86_v29 = vpop.permute.xlu1 %85  }
  0x8d   :  { %82 = vst.msk [vmem:[#allocation0] sm:$0x1] %vm81_vm13, %v80_v28  }
  0x8e   :  { %88 = vst.msk [vmem:[#allocation0] sm:$0x1] %vm87_vm14, %v86_v29  }
  0x90   :  { %v92_v30 = vpop.permute.xlu0 %91  }
  0x91   :  { %94 = vst.msk [vmem:[#allocation0] sm:$0x1] %vm93_vm15, %v92_v30  }
  0x98   :  { %v98_v31 = vld [vmem:[#allocation0] sm:$0x1] }
  0x99   :  { %100 = vst [vmem:[%s208_s1] sm:$0x1] %v98_v31 }

// kernel: gs_bottleneck.1
= control target key start
LH: loop header
LB: loop body
LE: loop exit
PB: predicated region body
PF: predicated region fallthrough
CT: control target
= control target key end

     0   :  { %s2544_s13 = smov 0   ;;  %s3235_s0 = inlined_call_operand.vmem [shape: f32[2,16,128], index: 0, kind: input, shape index: {}]   ;;  %s3236_s1 = inlined_call_operand.vmem [shape: f32[3,128,192], index: 1, kind: input, shape index: {}]   ;;  %s3237_s2 = inlined_call_operand.vmem [shape: f32[1,128], index: 2, kind: input, shape index: {}]   ;;  %s3238_s3 = inlined_call_operand.vmem [shape: f32[1,64], index: 3, kind: input, shape index: {}]   ;;  %s3239_s4 = inlined_call_operand.vmem [shape: f32[3,64,64], index: 4, kind: input, shape index: {}]   ;;  %s3240_s5 = inlined_call_operand.vmem [shape: f32[1,64], index: 5, kind: input, shape index: {}]   ;;  %s3241_s6 = inlined_call_operand.vmem [shape: f32[3,64,128], index: 6, kind: input, shape index: {}]   ;;  %s3242_s7 = inlined_call_operand.vmem [shape: f32[1,128], index: 7, kind: input, shape index: {}]   ;;  %s3243_s8 = inlined_call_operand.vmem [shape: f32[3,128,128], index: 8, kind: input, shape index: {}]   ;;  %s3244_s9 = inlined_call_operand.vmem [shape: f32[1,128], index: 9, kind: input, shape index: {}]   ;;  %s3245_s10 = inlined_call_operand.vmem [shape: f32[2,16,128], index: 10, kind: output, shape index: {}]  }
   0x1 LB: > { %s1672_s14 = sadd.s32 4294967295, %s2486_s13   ;;  %p1676_p0 = scmp.ge.s32.totalorder %s2486_s13, 1  ;;  %s2486_s13 = sphi %s2544_s13, %s20_s13  }
   0x2   : > { %p312_p1 = scmp.lt.s32.totalorder %s2486_s13, 3 }
   0x4   : > { %p313_p2 = pnand %p1676_p0, %p312_p1 }
   0x5   : > { %v369_v0 = vld [vmem:[%s3236_s1 + $0x8] sm:$0xff] (!%p313_p2)  ;;  %v371_v1 = vld [vmem:[%s3236_s1 + $0x18] sm:$0xff] (!%p313_p2)  ;;  %v368_v2 = vld [vmem:[%s3236_s1] sm:$0xff] (!%p313_p2)  ;;  %p2561_p3 = scmp.lt.s32.totalorder (!%p313_p2), %s1672_s14, 1  ;;  %v2488_v7 = vmov (!%p313_p2), 0.0   ;;  %vm727_vm0 = vcmask (!%p313_p2), 516096  }
   0x6   : > { %316 = sbr.rel (%p313_p2) target bundleno = 1099 (0x44b), region = 60  ;;  %v2195_v3 = vpack.c.bf16 (!%p313_p2), %v371_v1, %v369_v0  ;;  %v370_v4 = vld [vmem:[%s3236_s1 + $0x10] sm:$0xff] (!%p313_p2)  ;;  %v373_v5 = vld [vmem:[%s3236_s1 + $0x28] sm:$0xff] (!%p313_p2)  ;;  %v375_v6 = vld [vmem:[%s3236_s1 + $0x38] sm:$0xff] (!%p313_p2)  ;;  %576 = vmatprep.mubr.f32.mxu0 (!%p313_p2), %v2488_v7  ;;  %360 = vst [vmem:[#allocation2] sm:$0x1] (!%p313_p2), %v2488_v7  ;;  %499 = vmatprep.mubr.f32.mxu1 (!%p313_p2), %v2488_v7 }
   0x7   : > { %361 = vst [vmem:[#allocation2 + $0x11] sm:$0x1] (!%p313_p2), %v2488_v7  ;;  %1025 = vst [vmem:[#allocation4] sm:$0x1] (!%p313_p2), %v2488_v7  ;;  %v2197_v8 = vpack.c.bf16 (!%p313_p2), %v370_v4, %v368_v2  ;;  %v2199_v9 = vpack.c.bf16 (!%p313_p2), %v375_v6, %v373_v5  ;;  %v372_v10 = vld [vmem:[%s3236_s1 + $0x20] sm:$0xff] (!%p313_p2)  ;;  %v374_v11 = vld [vmem:[%s3236_s1 + $0x30] sm:$0xff] (!%p313_p2) }
   0x8   : > { %1026 = vst [vmem:[#allocation4 + $0x11] sm:$0x1] (!%p313_p2), %v2488_v7  ;;  %v377_v12 = vld [vmem:[%s3236_s1 + $0x48] sm:$0xff] (!%p313_p2)  ;;  %2196 = vmatprep.subr.bf16.mxu0 (!%p313_p2), %v2195_v3  ;;  %v379_v13 = vld [vmem:[%s3236_s1 + $0x58] sm:$0xff] (!%p313_p2)  ;;  %v2201_v14 = vpack.c.bf16 (!%p313_p2), %v374_v11, %v372_v10  ;;  %v376_v16 = vld [vmem:[%s3236_s1 + $0x40] sm:$0xff] (!%p313_p2)  ;;  %vm730_vm1 = vcmask (!%p313_p2), 523264  }
   0x9   : > { %2198 = vmatpush1.bf16.msra.mxu0 (!%p313_p2), %v2197_v8  ;;  %v2203_v15 = vpack.c.bf16 (!%p313_p2), %v379_v13, %v377_v12  ;;  %v378_v17 = vld [vmem:[%s3236_s1 + $0x50] sm:$0xff] (!%p313_p2)  ;;  %v381_v18 = vld [vmem:[%s3236_s1 + $0x68] sm:$0xff] (!%p313_p2)  ;;  %v383_v19 = vld [vmem:[%s3236_s1 + $0x78] sm:$0xff] (!%p313_p2)  ;;  %728 = vst.msk [vmem:[#allocation3] sm:$0x1] (!%p313_p2), %vm727_vm0, %v2488_v7 }
   0xa   : > { %2200 = vmatprep.subr.bf16.mxu0 (!%p313_p2), %v2199_v9  ;;  %v2205_v20 = vpack.c.bf16 (!%p313_p2), %v378_v17, %v376_v16  ;;  %v2207_v21 = vpack.c.bf16 (!%p313_p2), %v383_v19, %v381_v18  ;;  %v380_v22 = vld [vmem:[%s3236_s1 + $0x60] sm:$0xff] (!%p313_p2)  ;;  %v382_v23 = vld [vmem:[%s3236_s1 + $0x70] sm:$0xff] (!%p313_p2)  ;;  %v385_v24 = vld [vmem:[%s3236_s1 + $0x88] sm:$0xff] (!%p313_p2)  ;;  %729 = vst.msk [vmem:[#allocation3 + $0x11] sm:$0x1] (!%p313_p2), %vm727_vm0, %v2488_v7 }
   0xb   : > { %v387_v25 = vld [vmem:[%s3236_s1 + $0x98] sm:$0xff] (!%p313_p2)  ;;  %v1682_v26 = vld [vmem:[%s3236_s1 + $0x108] sm:$0xff] (!%p313_p2)  ;;  %v1681_v28 = vld [vmem:[%s3236_s1 + $0x100] sm:$0xff] (!%p313_p2)  ;;  %v2209_v30 = vpack.c.bf16 (!%p313_p2), %v382_v23, %v380_v22 }
   0xc   : > { %v1684_v27 = vld [vmem:[%s3236_s1 + $0x118] sm:$0xff] (!%p313_p2)  ;;  %v1683_v29 = vld [vmem:[%s3236_s1 + $0x110] sm:$0xff] (!%p313_p2)  ;;  %v384_v31 = vld [vmem:[%s3236_s1 + $0x80] sm:$0xff] (!%p313_p2)  ;;  %v2211_v36 = vpack.c.bf16 (!%p313_p2), %v387_v25, %v385_v24 }
   0xd   : > { %s3248_s14 = smov (!%p2561_p3, %s1672_s14), 1  ;;  %2202 = vmatpush1.bf16.msra.mxu0 %v2201_v14  ;;  %v386_v32 = vld [vmem:[%s3236_s1 + $0x90] sm:$0xff]  ;;  %v2163_v33 = vpack.c.bf16 %v1684_v27, %v1682_v26  ;;  %v2165_v34 = vpack.c.bf16 %v1683_v29, %v1681_v28  ;;  %v389_v37 = vld [vmem:[%s3236_s1 + $0xa8] sm:$0xff]  ;;  %v391_v38 = vld [vmem:[%s3236_s1 + $0xb8] sm:$0xff] }
   0xe   : > { %s1828_s26 = sshll.u32 %s3248_s14, 4  ;;  %2204 = vmatprep.subr.bf16.mxu0 %v2203_v15  ;;  %v1686_v39 = vld [vmem:[%s3236_s1 + $0x128] sm:$0xff]  ;;  %v1688_v40 = vld [vmem:[%s3236_s1 + $0x138] sm:$0xff]  ;;  %v1685_v41 = vld [vmem:[%s3236_s1 + $0x120] sm:$0xff]  ;;  %v2213_v45 = vpack.c.bf16 %v386_v32, %v384_v31  ;;  %v2215_v49 = vpack.c.bf16 %v391_v38, %v389_v37 }
   0xf   : > { %s2620_s15 = scalar_lea.vmem %s3235_s0, %s1828_s26  ;;  %2164 = vmatprep.subr.bf16.mxu1 %v2163_v33  ;;  %v1687_v42 = vld [vmem:[%s3236_s1 + $0x130] sm:$0xff]  ;;  %v2167_v43 = vpack.c.bf16 %v1688_v40, %v1686_v39  ;;  %v388_v46 = vld [vmem:[%s3236_s1 + $0xa0] sm:$0xff]  ;;  %v1690_v47 = vld [vmem:[%s3236_s1 + $0x148] sm:$0xff]  ;;  %s359_s29 = scalar_lea.vmem %s3245_s10, %s1828_s26 }
  0x10   : > { %v2647_v35 = vld [vmem:[%s2620_s15] sm:$0xff]  ;;  %2166 = vmatpush1.bf16.msra.mxu1 %v2165_v34  ;;  %v2169_v44 = vpack.c.bf16 %v1687_v42, %v1685_v41  ;;  %v1692_v48 = vld [vmem:[%s3236_s1 + $0x158] sm:$0xff]  ;;  %v390_v50 = vld [vmem:[%s3236_s1 + $0xb0] sm:$0xff] }
  0x11   : > { %2206 = vmatpush1.bf16.msra.mxu0 %v2205_v20  ;;  %364 = vst [vmem:[#allocation2 + $0x1] sm:$0xff] %v2647_v35  ;;  %2168 = vmatprep.subr.bf16.mxu1 %v2167_v43  ;;  %v2171_v51 = vpack.c.bf16 %v1692_v48, %v1690_v47  ;;  %v1689_v52 = vld [vmem:[%s3236_s1 + $0x140] sm:$0xff]  ;;  %v1691_v53 = vld [vmem:[%s3236_s1 + $0x150] sm:$0xff]  ;;  %v393_v54 = vld [vmem:[%s3236_s1 + $0xc8] sm:$0xff]  ;;  %v2217_v59 = vpack.c.bf16 %v390_v50, %v388_v46 }
  0x12   : > { %2208 = vmatprep.subr.bf16.mxu0 %v2207_v21  ;;  %v395_v55 = vld [vmem:[%s3236_s1 + $0xd8] sm:$0xff]  ;;  %v2173_v56 = vpack.c.bf16 %v1691_v53, %v1689_v52  ;;  %v1694_v57 = vld [vmem:[%s3236_s1 + $0x168] sm:$0xff]  ;;  %v1693_v61 = vld [vmem:[%s3236_s1 + $0x160] sm:$0xff] }
  0x13   : > { %v1696_v58 = vld [vmem:[%s3236_s1 + $0x178] sm:$0xff]  ;;  %v1695_v62 = vld [vmem:[%s3236_s1 + $0x170] sm:$0xff]  ;;  %v2219_v63 = vpack.c.bf16 %v395_v55, %v393_v54  ;;  %v392_v0 = vld [vmem:[%s3236_s1 + $0xc0] sm:$0xff] }
  0x14   : > { %2170 = vmatpush1.bf16.msra.mxu1 %v2169_v44  ;;  %v2175_v60 = vpack.c.bf16 %v1696_v58, %v1694_v57  ;;  %v394_v1 = vld [vmem:[%s3236_s1 + $0xd0] sm:$0xff]  ;;  %v397_v2 = vld [vmem:[%s3236_s1 + $0xe8] sm:$0xff]  ;;  %v399_v3 = vld [vmem:[%s3236_s1 + $0xf8] sm:$0xff]  ;;  %v2177_v6 = vpack.c.bf16 %v1695_v62, %v1693_v61 }
  0x15   : > { %2210 = vmatpush1.bf16.msra.mxu0 %v2209_v30  ;;  %2172 = vmatprep.subr.bf16.mxu1 %v2171_v51  ;;  %v1698_v4 = vld [vmem:[%s3236_s1 + $0x188] sm:$0xff]  ;;  %v1700_v5 = vld [vmem:[%s3236_s1 + $0x198] sm:$0xff]  ;;  %v2221_v8 = vpack.c.bf16 %v394_v1, %v392_v0  ;;  %v396_v9 = vld [vmem:[%s3236_s1 + $0xe0] sm:$0xff]  ;;  %v2223_v13 = vpack.c.bf16 %v399_v3, %v397_v2 }
  0x16   : > { %2212 = vmatprep.subr.bf16.mxu0 %v2211_v36  ;;  %v2179_v10 = vpack.c.bf16 %v1700_v5, %v1698_v4  ;;  %v1697_v11 = vld [vmem:[%s3236_s1 + $0x180] sm:$0xff]  ;;  %v1699_v12 = vld [vmem:[%s3236_s1 + $0x190] sm:$0xff]  ;;  %v1702_v15 = vld [vmem:[%s3236_s1 + $0x1a8] sm:$0xff] }
  0x17   : > { %v398_v14 = vld [vmem:[%s3236_s1 + $0xf0] sm:$0xff]  ;;  %v1704_v16 = vld [vmem:[%s3236_s1 + $0x1b8] sm:$0xff]  ;;  %v1714_v17 = vld [vmem:[%s3236_s1 + $0x208] sm:$0xff]  ;;  %v2181_v19 = vpack.c.bf16 %v1699_v12, %v1697_v11 }
  0x18   : > { %2174 = vmatpush1.bf16.msra.mxu1 %v2173_v56  ;;  %v1716_v18 = vld [vmem:[%s3236_s1 + $0x218] sm:$0xff]  ;;  %v2225_v20 = vpack.c.bf16 %v398_v14, %v396_v9  ;;  %v1713_v21 = vld [vmem:[%s3236_s1 + $0x200] sm:$0xff]  ;;  %v2183_v22 = vpack.c.bf16 %v1704_v16, %v1702_v15  ;;  %v1703_v24 = vld [vmem:[%s3236_s1 + $0x1b0] sm:$0xff] }
  0x19   : > { %2214 = vmatpush1.bf16.msra.mxu0 %v2213_v45  ;;  %2176 = vmatprep.subr.bf16.mxu1 %v2175_v60  ;;  %v1701_v23 = vld [vmem:[%s3236_s1 + $0x1a0] sm:$0xff]  ;;  %v2227_v25 = vpack.c.bf16 %v1716_v18, %v1714_v17  ;;  %v1715_v26 = vld [vmem:[%s3236_s1 + $0x210] sm:$0xff]  ;;  %v1706_v27 = vld [vmem:[%s3236_s1 + $0x1c8] sm:$0xff] }
  0x1a   : > { %2216 = vmatprep.subr.bf16.mxu0 %v2215_v49  ;;  %v1708_v28 = vld [vmem:[%s3236_s1 + $0x1d8] sm:$0xff]  ;;  %v1718_v29 = vld [vmem:[%s3236_s1 + $0x228] sm:$0xff]  ;;  %v1717_v31 = vld [vmem:[%s3236_s1 + $0x220] sm:$0xff]  ;;  %v2185_v32 = vpack.c.bf16 %v1703_v24, %v1701_v23  ;;  %v2229_v36 = vpack.c.bf16 %v1715_v26, %v1713_v21 }
  0x1b   : > { %v1720_v30 = vld [vmem:[%s3236_s1 + $0x238] sm:$0xff]  ;;  %v2774_v33 = vld [vmem:[%s2620_s15 + $0x8] sm:$0xff]  ;;  %v366_v34 = vld [vmem:[#allocation2] sm:$0xff]  ;;  %v2187_v37 = vpack.c.bf16 %v1708_v28, %v1706_v27 }
  0x1c   : > { %2178 = vmatpush1.bf16.msra.mxu1 %v2177_v6  ;;  %v1705_v38 = vld [vmem:[%s3236_s1 + $0x1c0] sm:$0xff]  ;;  %v1707_v39 = vld [vmem:[%s3236_s1 + $0x1d0] sm:$0xff]  ;;  %365 = vst [vmem:[#allocation2 + $0x9] sm:$0xff] %v2774_v33  ;;  %v2231_v40 = vpack.c.bf16 %v1720_v30, %v1718_v29  ;;  %v1710_v42 = vld [vmem:[%s3236_s1 + $0x1e8] sm:$0xff] }
  0x1d   : > { %2218 = vmatpush1.bf16.msra.mxu0 %v2217_v59  ;;  %2180 = vmatprep.subr.bf16.mxu1 %v2179_v10  ;;  %v1719_v41 = vld [vmem:[%s3236_s1 + $0x230] sm:$0xff]  ;;  %v1712_v43 = vld [vmem:[%s3236_s1 + $0x1f8] sm:$0xff]  ;;  %v1722_v44 = vld [vmem:[%s3236_s1 + $0x248] sm:$0xff]  ;;  %v2189_v46 = vpack.c.bf16 %v1707_v39, %v1705_v38 }
  0x1e   : > { %2220 = vmatprep.subr.bf16.mxu0 %v2219_v63  ;;  %v1724_v45 = vld [vmem:[%s3236_s1 + $0x258] sm:$0xff]  ;;  %v2233_v47 = vpack.c.bf16 %v1719_v41, %v1717_v31  ;;  %v2191_v48 = vpack.c.bf16 %v1712_v43, %v1710_v42  ;;  %v1709_v49 = vld [vmem:[%s3236_s1 + $0x1e0] sm:$0xff]  ;;  %v1711_v50 = vld [vmem:[%s3236_s1 + $0x1f0] sm:$0xff] }
  0x1f   : > { %v2235_v51 = vpack.c.bf16 %v1724_v45, %v1722_v44  ;;  %v1721_v52 = vld [vmem:[%s3236_s1 + $0x240] sm:$0xff]  ;;  %v1723_v53 = vld [vmem:[%s3236_s1 + $0x250] sm:$0xff]  ;;  %v1726_v54 = vld [vmem:[%s3236_s1 + $0x268] sm:$0xff]  ;;  %v2193_v56 = vpack.c.bf16 %v1711_v50, %v1709_v49 }
  0x20   : > { %2182 = vmatpush1.bf16.msra.mxu1 %v2181_v19  ;;  %v1728_v55 = vld [vmem:[%s3236_s1 + $0x278] sm:$0xff]  ;;  %v2237_v58 = vpack.c.bf16 %v1723_v53, %v1721_v52  ;;  %v1725_v60 = vld [vmem:[%s3236_s1 + $0x260] sm:$0xff]  ;;  %v1727_v61 = vld [vmem:[%s3236_s1 + $0x270] sm:$0xff] }
  0x21   : > { %2222 = vmatpush1.bf16.msra.mxu0 %v2221_v8  ;;  %2184 = vmatprep.subr.bf16.mxu1 %v2183_v22  ;;  %v2239_v59 = vpack.c.bf16 %v1728_v55, %v1726_v54  ;;  %v1730_v62 = vld [vmem:[%s3236_s1 + $0x288] sm:$0xff]  ;;  %v1732_v63 = vld [vmem:[%s3236_s1 + $0x298] sm:$0xff]  ;;  %v2241_v0 = vpack.c.bf16 %v1727_v61, %v1725_v60  ;;  %v1729_v2 = vld [vmem:[%s3236_s1 + $0x280] sm:$0xff] }
  0x22   : > { %2224 = vmatprep.subr.bf16.mxu0 %v2223_v13  ;;  %v2243_v1 = vpack.c.bf16 %v1732_v63, %v1730_v62  ;;  %v1731_v3 = vld [vmem:[%s3236_s1 + $0x290] sm:$0xff]  ;;  %v1734_v4 = vld [vmem:[%s3236_s1 + $0x2a8] sm:$0xff]  ;;  %v1736_v5 = vld [vmem:[%s3236_s1 + $0x2b8] sm:$0xff] }
  0x23   : > { %v367_v57 = vld [vmem:[#allocation2 + $0x8] sm:$0xff]  ;;  %v2245_v6 = vpack.c.bf16 %v1731_v3, %v1729_v2  ;;  %v2247_v8 = vpack.c.bf16 %v1736_v5, %v1734_v4  ;;  %v1733_v9 = vld [vmem:[%s3236_s1 + $0x2a0] sm:$0xff]  ;;  %v1735_v10 = vld [vmem:[%s3236_s1 + $0x2b0] sm:$0xff] }
  0x24   : > { %2186 = vmatpush1.bf16.msra.mxu1 %v2185_v32  ;;  %v1738_v11 = vld [vmem:[%s3236_s1 + $0x2c8] sm:$0xff]  ;;  %v2249_v12 = vpack.c.bf16 %v1735_v10, %v1733_v9  ;;  %v1737_v14 = vld [vmem:[%s3236_s1 + $0x2c0] sm:$0xff]  ;;  %v1739_v15 = vld [vmem:[%s3236_s1 + $0x2d0] sm:$0xff] }
  0x25   : > { %2226 = vmatpush1.bf16.msra.mxu0 %v2225_v20  ;;  %2188 = vmatprep.subr.bf16.mxu1 %v2187_v37  ;;  %v1742_v16 = vld [vmem:[%s3236_s1 + $0x2e8] sm:$0xff]  ;;  %v1744_v17 = vld [vmem:[%s3236_s1 + $0x2f8] sm:$0xff]  ;;  %v2253_v18 = vpack.c.bf16 %v1739_v15, %v1737_v14  ;;  %v1741_v20 = vld [vmem:[%s3236_s1 + $0x2e0] sm:$0xff] }
  0x26   : > { %2228 = vmatprep.subr.bf16.mxu0 %v2227_v25  ;;  %v2255_v19 = vpack.c.bf16 %v1744_v17, %v1742_v16  ;;  %v1743_v21 = vld [vmem:[%s3236_s1 + $0x2f0] sm:$0xff]  ;;  %v589_v23 = vld [vmem:[#allocation2 + $0x2] sm:$0xff]  ;;  %v1750_v29 = vld [vmem:[%s3239_s4 + $0x58] sm:$0xff] }
  0x27   : > { %v2257_v22 = vpack.c.bf16 %v1743_v21, %v1741_v20  ;;  %v590_v24 = vld [vmem:[#allocation2 + $0xa] sm:$0xff]  ;;  %v1747_v25 = vld [vmem:[%s3239_s4 + $0x40] sm:$0xff]  ;;  %v742_v3 = vld [vmem:[%s3239_s4 + $0x38] sm:$0xff] }
  0x28   : > { %577 = vmatmul.mubr.f32.vlgmr.msra.gmra.mrb[0].mxu0 %v366_v34  ;;  %2190 = vmatpush1.bf16.msra.mxu1 %v2189_v46  ;;  %v1748_v26 = vld [vmem:[%s3239_s4 + $0x48] sm:$0xff]  ;;  %v1749_v28 = vld [vmem:[%s3239_s4 + $0x50] sm:$0xff]  ;;  %v1751_v31 = vld [vmem:[%s3239_s4 + $0x60] sm:$0xff] }
  0x29   : > { %2230 = vmatpush1.bf16.msra.mxu0 %v2229_v36  ;;  %582 = vmatprep.mubr.f32.mxu0 %v2488_v7  ;;  %v2259_v27 = vpack.c.bf16 %v1748_v26, %v1747_v25  ;;  %v2263_v30 = vpack.c.bf16 %v1750_v29, %v1749_v28  ;;  %v1752_v32 = vld [vmem:[%s3239_s4 + $0x68] sm:$0xff]  ;;  %v1753_v34 = vld [vmem:[%s3239_s4 + $0x70] sm:$0xff]  ;;  %v1754_v36 = vld [vmem:[%s3239_s4 + $0x78] sm:$0xff] }
  0x2a   : > { %2232 = vmatprep.subr.bf16.mxu0 %v2231_v40  ;;  %2192 = vmatprep.subr.bf16.mxu1 %v2191_v48  ;;  %v2271_v37 = vpack.c.bf16 %v1754_v36, %v1753_v34  ;;  %v735_v38 = vld [vmem:[%s3239_s4] sm:$0xff]  ;;  %v740_v63 = vld [vmem:[%s3239_s4 + $0x28] sm:$0xff]  ;;  %v741_v2 = vld [vmem:[%s3239_s4 + $0x30] sm:$0xff] }
  0x2b   : > { %v739_v62 = vld [vmem:[%s3239_s4 + $0x20] sm:$0xff]  ;;  %v2287_v4 = vpack.c.bf16 %v742_v3, %v741_v2  ;;  %v1761_v9 = vld [vmem:[%s3239_s4 + $0x90] sm:$0xff]  ;;  %v1762_v10 = vld [vmem:[%s3239_s4 + $0x98] sm:$0xff] }
  0x2c   : > { %583 = vmatmul.mubr.f32.gmra.mrb[2].mxu0 %v367_v57  ;;  %2194 = vmatpush1.bf16.msra.mxu1 %v2193_v56  ;;  %v1759_v5 = vld [vmem:[%s3239_s4 + $0x80] sm:$0xff]  ;;  %v1765_v16 = vld [vmem:[%s3239_s4 + $0xb0] sm:$0xff]  ;;  %v1766_v17 = vld [vmem:[%s3239_s4 + $0xb8] sm:$0xff] }
  0x2d   : > { %2234 = vmatpush1.bf16.msra.mxu0 %v2233_v47  ;;  %688 = vmatprep.mubr.f32.mxu0 %v2488_v7  ;;  %v1746_v47 = vld [vmem:[%s3238_s3] ss:$0 sm:$0xff]  ;;  %v1771_v21 = vld [vmem:[%s3241_s6 + $0x48] sm:$0xff]  ;;  %v1776_v29 = vld [vmem:[%s3241_s6 + $0x70] sm:$0xff] }
  0x2e   : > { %2236 = vmatprep.subr.bf16.mxu0 %v2235_v51  ;;  %2260 = vmatprep.subr.bf16.mxu1 %v2259_v27  ;;  %v1770_v20 = vld [vmem:[%s3241_s6 + $0x40] sm:$0xff]  ;;  %v1032_v2 = vld [vmem:[%s3241_s6 + $0x18] sm:$0xff] }
  0x2f   : > { %500 = vmatmul.mubr.f32.vlgmr.msra.gmra.mrb[0].mxu1 %v2647_v35  ;;  %v1740_v35 = vld [vmem:[%s3236_s1 + $0x2d8] sm:$0xff]  ;;  %v1774_v26 = vld [vmem:[%s3241_s6 + $0x60] sm:$0xff] }
  0x30   : > { %505 = vmatprep.mubr.f32.mxu1 %v2488_v7  ;;  %v2251_v13 = vpack.c.bf16 %v1740_v35, %v1738_v11  ;;  %2262 = vmatpush3.bf16.msra.mxu1 %v2259_v27  ;;  %v2295_v11 = vpack.c.bf16 %v1762_v10, %v1761_v9  ;;  %v1775_v27 = vld [vmem:[%s3241_s6 + $0x68] sm:$0xff]  ;;  %v1793_v36 = vld [vmem:[%s3243_s8 + $0x80] sm:$0xff] }
  0x31   : > { %2238 = vmatpush1.bf16.msra.mxu0 %v2237_v58  ;;  %2264 = vmatprep.subr.bf16.mxu1 %v2263_v30  ;;  %v737_v58 = vld [vmem:[%s3239_s4 + $0x10] sm:$0xff]  ;;  %v2315_v28 = vpack.c.bf16 %v1775_v27, %v1774_v26  ;;  %v1782_v10 = vld [vmem:[%s3241_s6 + $0x80] sm:$0xff] }
  0x32   : > { %2240 = vmatprep.subr.bf16.mxu0 %v2239_v59  ;;  %v738_v59 = vld [vmem:[%s3239_s4 + $0x18] sm:$0xff]  ;;  %v1805_v27 = vld [vmem:[%s3243_s8 + $0xe0] sm:$0xff] }
  0x33   : > { %506 = vmatmul.mubr.f32.gmra.mrb[2].mxu1 %v2774_v33  ;;  %v2267_v33 = vpack.c.bf16 %v1752_v32, %v1751_v31  ;;  %v2279_v60 = vpack.c.bf16 %v738_v59, %v737_v58  ;;  %v1029_v32 = vld [vmem:[%s3241_s6] sm:$0xff] }
  0x34   : > { %2266 = vmatpush3.bf16.msra.mxu1 %v2263_v30  ;;  %v1777_v30 = vld [vmem:[%s3241_s6 + $0x78] sm:$0xff] }
  0x35   : > { %2242 = vmatpush1.bf16.msra.mxu0 %v2241_v0  ;;  %2268 = vmatprep.subr.bf16.mxu1 %v2267_v33  ;;  %v2319_v31 = vpack.c.bf16 %v1777_v30, %v1776_v29  ;;  %v1807_v30 = vld [vmem:[%s3243_s8 + $0xf0] sm:$0xff] }
  0x36   : > { %2244 = vmatprep.subr.bf16.mxu0 %v2243_v1  ;;  %v2283_v1 = vpack.c.bf16 %v740_v63, %v739_v62 }
  0x38   : > { %2270 = vmatpush3.bf16.msra.mxu1 %v2267_v33  ;;  %v1030_v33 = vld [vmem:[%s3241_s6 + $0x8] sm:$0xff] }
  0x39   : > { %2246 = vmatpush1.bf16.msra.mxu0 %v2245_v6  ;;  %2272 = vmatprep.subr.bf16.mxu1 %v2271_v37  ;;  %v1760_v6 = vld [vmem:[%s3239_s4 + $0x88] sm:$0xff]  ;;  %v2323_v34 = vpack.c.bf16 %v1030_v33, %v1029_v32  ;;  %v1319_v33 = vld [vmem:[%s3243_s8] sm:$0xff] }
  0x3a   : > { %2248 = vmatprep.subr.bf16.mxu0 %v2247_v8  ;;  %v2291_v8 = vpack.c.bf16 %v1760_v6, %v1759_v5  ;;  %v1035_v6 = vld [vmem:[%s3241_s6 + $0x30] sm:$0xff] }
  0x3c   : > { %2274 = vmatpush3.bf16.msra.mxu1 %v2271_v37  ;;  %v1794_v37 = vld [vmem:[%s3243_s8 + $0x88] sm:$0xff] }
  0x3d   : > { %2250 = vmatpush1.bf16.msra.mxu0 %v2249_v12  ;;  %v1763_v12 = vld [vmem:[%s3239_s4 + $0xa0] sm:$0xff] }
  0x3e   : > { %2252 = vmatprep.subr.bf16.mxu0 %v2251_v13  ;;  %v1764_v13 = vld [vmem:[%s3239_s4 + $0xa8] sm:$0xff] }
  0x3f   : > { %v2299_v15 = vpack.c.bf16 %v1764_v13, %v1763_v12  ;;  %v1784_v12 = vld [vmem:[%s3241_s6 + $0x90] sm:$0xff]  ;;  %v1785_v13 = vld [vmem:[%s3241_s6 + $0x98] sm:$0xff] }
  0x41   : > { %2254 = vmatpush1.bf16.msra.mxu0 %v2253_v18  ;;  %v2303_v18 = vpack.c.bf16 %v1766_v17, %v1765_v16  ;;  %v1786_v16 = vld [vmem:[%s3241_s6 + $0xa0] sm:$0xff]  ;;  %v1787_v17 = vld [vmem:[%s3241_s6 + $0xa8] sm:$0xff] }
  0x42   : > { %2256 = vmatprep.subr.bf16.mxu0 %v2255_v19 }
  0x45   : > { %2258 = vmatpush1.bf16.msra.mxu0 %v2257_v22  ;;  %v2307_v22 = vpack.c.bf16 %v1771_v21, %v1770_v20  ;;  %v1788_v20 = vld [vmem:[%s3241_s6 + $0xb0] sm:$0xff]  ;;  %v1789_v21 = vld [vmem:[%s3241_s6 + $0xb8] sm:$0xff] }
  0x48   : > { %689 = vmatmul.mubr.f32.vlgmr.msra.gmra.mrb[0].mxu0 %v589_v23  ;;  %v1772_v23 = vld [vmem:[%s3241_s6 + $0x50] sm:$0xff] }
  0x49   : > { %694 = vmatprep.mubr.f32.mxu0 %v2488_v7  ;;  %v736_v7 = vld [vmem:[%s3239_s4 + $0x8] sm:$0xff] }
  0x4a   : > { %v2275_v39 = vpack.c.bf16 %v736_v7, %v735_v38  ;;  %v1795_v38 = vld [vmem:[%s3243_s8 + $0x90] sm:$0xff]  ;;  %v2355_v7 = vpack.c.bf16 %v1794_v37, %v1793_v36  ;;  %v1792_v37 = vld [vmem:[%s3242_s7] ss:$0 sm:$0xff] }
  0x4c   : > { %695 = vmatmul.mubr.f32.gmra.mrb[2].mxu0 %v590_v24  ;;  %2276 = vmatprep.subr.bf16.mxu1 %v2275_v39  ;;  %v1773_v24 = vld [vmem:[%s3241_s6 + $0x58] sm:$0xff] }
  0x4d   : > { %v2311_v25 = vpack.c.bf16 %v1773_v24, %v1772_v23  ;;  %2356 = vmatprep.subr.bf16.mxu0 %v2355_v7  ;;  %v1803_v24 = vld [vmem:[%s3243_s8 + $0xd0] sm:$0xff] }
  0x4e   : > { %2358 = vmatpush3.bf16.msra.mxu0 %v2355_v7 }
 0x102   : > { %v501_v40 = vpop.f32.mrb[0].mxu1 }
 0x103   : > { %v503_v41 = vpop.f32.mrb[1].mxu1 }
 0x106   : > { %v507_v42 = vpop.f32.mrb[2].mxu1 }
 0x107   : > { %v509_v43 = vpop.f32.mrb[3].mxu1 }
 0x11b   : > { %v690_v44 = vpop.f32.mrb[0].mxu0 }
 0x11c   : > { %v2908_v45 = vadd.f32 %v690_v44, %v501_v40  ;;  %v692_v46 = vpop.f32.mrb[1].mxu0  ;;  %v1799_v44 = vld [vmem:[%s3243_s8 + $0xb0] sm:$0xff] }
 0x11d   : > { %v2452_v48 = vadd.f32 %v692_v46, %v503_v41  ;;  %v1797_v41 = vld [vmem:[%s3243_s8 + $0xa0] sm:$0xff]  ;;  %v1800_v46 = vld [vmem:[%s3243_s8 + $0xb8] sm:$0xff] }
 0x11f   : > { %v2913_v49 = vadd.f32 %v2452_v48, %v1746_v47  ;;  %v696_v50 = vpop.f32.mrb[2].mxu0  ;;  %v1801_v48 = vld [vmem:[%s3243_s8 + $0xc0] sm:$0xff] }
 0x120   : > { %v2915_v51 = vadd.f32 %v696_v50, %v507_v42  ;;  %v698_v52 = vpop.f32.mrb[3].mxu0  ;;  %v1798_v42 = vld [vmem:[%s3243_s8 + $0xa8] sm:$0xff] }
 0x121   : > { %v725_v53 = vmax.f32 %v2913_v49, 0.0  ;;  %v2454_v54 = vadd.f32 %v698_v52, %v509_v43  ;;  %v2363_v43 = vpack.c.bf16 %v1798_v42, %v1797_v41  ;;  %v1802_v50 = vld [vmem:[%s3243_s8 + $0xc8] sm:$0xff]  ;;  %v1033_v49 = vld [vmem:[%s3241_s6 + $0x20] sm:$0xff]  ;;  %v1321_v41 = vld [vmem:[%s3243_s8 + $0x10] sm:$0xff] }
 0x122   : > { %v2371_v52 = vpack.c.bf16 %v1802_v50, %v1801_v48  ;;  %v1322_v42 = vld [vmem:[%s3243_s8 + $0x18] sm:$0xff]  ;;  %v1324_v48 = vld [vmem:[%s3243_s8 + $0x28] sm:$0xff] }
 0x123   : > { %731 = vst.msk [vmem:[#allocation3 + $0x1] sm:$0xff] %vm730_vm1, %v725_v53  ;;  %v2921_v55 = vadd.f32 %v2454_v54, %v1746_v47  ;;  %v2367_v47 = vpack.c.bf16 %v1800_v46, %v1799_v44  ;;  %v1769_v54 = vld [vmem:[%s3240_s5] ss:$0 sm:$0xff]  ;;  %v2391_v46 = vpack.c.bf16 %v1322_v42, %v1321_v41 }
 0x125   : > { %v726_v56 = vmax.f32 %v2921_v55, 0.0 }
 0x127   : > { %732 = vst.msk [vmem:[#allocation3 + $0x9] sm:$0xff] %vm730_vm1, %v726_v56 }
 0x12a   : > { %v743_v57 = vld [vmem:[#allocation3 + $0x1] sm:$0xff] }
 0x12b   : > { %1960 = vmatprep.mubr.msk.f32.mxu1 %vm730_vm1, %v743_v57  ;;  %v733_v0 = vld [vmem:[#allocation3] sm:$0xff] }
 0x12e   : > { %v744_v61 = vld [vmem:[#allocation3 + $0x9] sm:$0xff] }
 0x12f   : > { %1961 = vmatmul.mubr.msk.f32.vlgmr.msra.gmra.mrb[4].mxu1 %vm730_vm1, %v744_v61  ;;  %v734_v35 = vld [vmem:[#allocation3 + $0x8] sm:$0xff] }
 0x130   : > { %2278 = vmatpush3.bf16.msra.mxu1 %v2275_v39  ;;  %1979 = vmatprep.mubr.msk.f32.mxu1 %vm730_vm1, %v733_v0  ;;  %v916_v14 = vld [vmem:[#allocation3 + $0x2] sm:$0xff]  ;;  %v917_v19 = vld [vmem:[#allocation3 + $0xa] sm:$0xff] }
 0x131   : > { %2280 = vmatprep.subr.bf16.mxu1 %v2279_v60  ;;  %v1796_v39 = vld [vmem:[%s3243_s8 + $0x98] sm:$0xff] }
 0x132   : > { %v2359_v40 = vpack.c.bf16 %v1796_v39, %v1795_v38 }
 0x134   : > { %2282 = vmatpush3.bf16.msra.mxu1 %v2279_v60  ;;  %2360 = vmatprep.subr.bf16.mxu0 %v2359_v40 }
 0x135   : > { %2284 = vmatprep.subr.bf16.mxu1 %v2283_v1  ;;  %2362 = vmatpush3.bf16.msra.mxu0 %v2359_v40 }
 0x136   : > { %2364 = vmatprep.subr.bf16.mxu0 %v2363_v43 }
 0x138   : > { %2286 = vmatpush3.bf16.msra.mxu1 %v2283_v1  ;;  %v1031_v1 = vld [vmem:[%s3241_s6 + $0x10] sm:$0xff] }
 0x139   : > { %2288 = vmatprep.subr.bf16.mxu1 %v2287_v4  ;;  %2366 = vmatpush3.bf16.msra.mxu0 %v2363_v43 }
 0x13a   : > { %2368 = vmatprep.subr.bf16.mxu0 %v2367_v47 }
 0x13c   : > { %2290 = vmatpush3.bf16.msra.mxu1 %v2287_v4  ;;  %v2327_v4 = vpack.c.bf16 %v1032_v2, %v1031_v1  ;;  %v1331_v1 = vld [vmem:[%s3243_s8 + $0x60] sm:$0xff]  ;;  %v1332_v2 = vld [vmem:[%s3243_s8 + $0x68] sm:$0xff] }
 0x13d   : > { %2292 = vmatprep.subr.bf16.mxu1 %v2291_v8  ;;  %2370 = vmatpush3.bf16.msra.mxu0 %v2367_v47  ;;  %v1323_v47 = vld [vmem:[%s3243_s8 + $0x20] sm:$0xff] }
 0x13e   : > { %2372 = vmatprep.subr.bf16.mxu0 %v2371_v52  ;;  %v2395_v50 = vpack.c.bf16 %v1324_v48, %v1323_v47 }
 0x13f   : > { %1980 = vmatmul.mubr.msk.f32.vlgmr.msra.gmra.mrb[4].mxu1 %vm730_vm1, %v734_v35 }
 0x140   : > { %2294 = vmatpush3.bf16.msra.mxu1 %v2291_v8  ;;  %1998 = vmatprep.mubr.msk.f32.mxu1 %vm730_vm1, %v916_v14  ;;  %v1036_v8 = vld [vmem:[%s3241_s6 + $0x38] sm:$0xff]  ;;  %v2343_v14 = vpack.c.bf16 %v1785_v13, %v1784_v12 }
 0x141   : > { %2296 = vmatprep.subr.bf16.mxu1 %v2295_v11  ;;  %2374 = vmatpush3.bf16.msra.mxu0 %v2371_v52  ;;  %v2335_v9 = vpack.c.bf16 %v1036_v8, %v1035_v6  ;;  %v1325_v52 = vld [vmem:[%s3243_s8 + $0x30] sm:$0xff]  ;;  %v1812_v8 = vld [vmem:[%s3243_s8 + $0x118] sm:$0xff] }
 0x142   : > { %v1811_v6 = vld [vmem:[%s3243_s8 + $0x110] sm:$0xff] }
 0x144   : > { %2298 = vmatpush3.bf16.msra.mxu1 %v2295_v11  ;;  %v1783_v11 = vld [vmem:[%s3241_s6 + $0x88] sm:$0xff] }
 0x145   : > { %2300 = vmatprep.subr.bf16.mxu1 %v2299_v15  ;;  %v2339_v35 = vpack.c.bf16 %v1783_v11, %v1782_v10  ;;  %v1813_v11 = vld [vmem:[%s3243_s8 + $0x120] sm:$0xff] }
 0x148   : > { %2302 = vmatpush3.bf16.msra.mxu1 %v2299_v15 }
 0x149   : > { %2304 = vmatprep.subr.bf16.mxu1 %v2303_v18 }
 0x14c   : > { %2306 = vmatpush3.bf16.msra.mxu1 %v2303_v18 }
 0x14d   : > { %2308 = vmatprep.subr.bf16.mxu1 %v2307_v22 }
 0x14f   : > { %1999 = vmatmul.mubr.msk.f32.vlgmr.msra.gmra.mrb[4].mxu1 %vm730_vm1, %v917_v19  ;;  %v2347_v19 = vpack.c.bf16 %v1787_v17, %v1786_v16  ;;  %v1817_v17 = vld [vmem:[%s3243_s8 + $0x140] sm:$0xff] }
 0x150   : > { %2310 = vmatpush3.bf16.msra.mxu1 %v2307_v22  ;;  %v2351_v22 = vpack.c.bf16 %v1789_v21, %v1788_v20  ;;  %v1819_v20 = vld [vmem:[%s3243_s8 + $0x150] sm:$0xff]  ;;  %v1820_v21 = vld [vmem:[%s3243_s8 + $0x158] sm:$0xff] }
 0x151   : > { %2312 = vmatprep.subr.bf16.mxu1 %v2311_v25 }
 0x154   : > { %2314 = vmatpush3.bf16.msra.mxu1 %v2311_v25  ;;  %v1804_v25 = vld [vmem:[%s3243_s8 + $0xd8] sm:$0xff] }
 0x155   : > { %2316 = vmatprep.subr.bf16.mxu1 %v2315_v28  ;;  %v2375_v26 = vpack.c.bf16 %v1804_v25, %v1803_v24  ;;  %v1822_v24 = vld [vmem:[%s3243_s8 + $0x168] sm:$0xff] }
 0x157   : > { %2376 = vmatprep.subr.bf16.mxu0 %v2375_v26 }
 0x158   : > { %2318 = vmatpush3.bf16.msra.mxu1 %v2315_v28  ;;  %2378 = vmatpush3.bf16.msra.mxu0 %v2375_v26  ;;  %v1806_v28 = vld [vmem:[%s3243_s8 + $0xe8] sm:$0xff]  ;;  %v1823_v26 = vld [vmem:[%s3243_s8 + $0x170] sm:$0xff] }
 0x159   : > { %2320 = vmatprep.subr.bf16.mxu1 %v2319_v31  ;;  %v2379_v29 = vpack.c.bf16 %v1806_v28, %v1805_v27  ;;  %v1824_v27 = vld [vmem:[%s3243_s8 + $0x178] sm:$0xff] }
 0x15a   : > { %v2447_v28 = vpack.c.bf16 %v1824_v27, %v1823_v26 }
 0x15b   : > { %2380 = vmatprep.subr.bf16.mxu0 %v2379_v29 }
 0x15c   : > { %2322 = vmatpush3.bf16.msra.mxu1 %v2319_v31  ;;  %2382 = vmatpush3.bf16.msra.mxu0 %v2379_v29  ;;  %v1808_v31 = vld [vmem:[%s3243_s8 + $0xf8] sm:$0xff] }
 0x15d   : > { %2324 = vmatprep.subr.bf16.mxu1 %v2323_v34  ;;  %v2383_v32 = vpack.c.bf16 %v1808_v31, %v1807_v30  ;;  %v1825_v30 = vld [vmem:[%s3244_s9] ss:$0 sm:$0xff] }
 0x15e   : > { %v1745_v31 = vld [vmem:[%s3237_s2] ss:$0 sm:$0xff] }
 0x15f   : > { %2384 = vmatprep.subr.bf16.mxu0 %v2383_v32 }
 0x160   : > { %2386 = vmatpush3.bf16.msra.mxu0 %v2383_v32 }
 0x222   : > { %v2000_v57 = vpop.f32.mrb[4].mxu1 }
 0x223   : > { %v1018_v58 = vadd.f32 %v2000_v57, %v1769_v54  ;;  %v999_v59 = vpop.f32.mrb[5].mxu1 }
 0x224   : > { %v1017_v60 = vadd.f32 %v1769_v54, %v999_v59  ;;  %v1326_v54 = vld [vmem:[%s3243_s8 + $0x38] sm:$0xff]  ;;  %v1327_v59 = vld [vmem:[%s3243_s8 + $0x40] sm:$0xff] }
 0x225   : > { %v1020_v61 = vmax.f32 %v1018_v58, 0.0  ;;  %v2399_v58 = vpack.c.bf16 %v1326_v54, %v1325_v52 }
 0x226   : > { %v1019_v62 = vmax.f32 %v1017_v60, 0.0  ;;  %v1328_v60 = vld [vmem:[%s3243_s8 + $0x48] sm:$0xff] }
 0x227   : > { %v1022_v63 = vadd.f32 %v1020_v61, %v726_v56  ;;  %v2403_v61 = vpack.c.bf16 %v1328_v60, %v1327_v59 }
 0x228   : > { %v1021_v0 = vadd.f32 %v1019_v62, %v725_v53  ;;  %v1034_v53 = vld [vmem:[%s3241_s6 + $0x28] sm:$0xff]  ;;  %v1329_v62 = vld [vmem:[%s3243_s8 + $0x50] sm:$0xff] }
 0x229   : > { %1024 = vst.msk [vmem:[#allocation3 + $0x9] sm:$0xff] %vm730_vm1, %v1022_v63  ;;  %v2331_v5 = vpack.c.bf16 %v1034_v53, %v1033_v49  ;;  %v1330_v63 = vld [vmem:[%s3243_s8 + $0x58] sm:$0xff]  ;;  %v1809_v53 = vld [vmem:[%s3243_s8 + $0x100] sm:$0xff] }
 0x22a   : > { %1023 = vst.msk [vmem:[#allocation3 + $0x1] sm:$0xff] %vm730_vm1, %v1021_v0  ;;  %v2407_v0 = vpack.c.bf16 %v1330_v63, %v1329_v62 }
 0x230   : > { %v1038_v55 = vld [vmem:[#allocation3 + $0x9] sm:$0xff] }
 0x231   : > { %v1037_v3 = vld [vmem:[#allocation3 + $0x1] sm:$0xff]  ;;  %v1211_v23 = vld [vmem:[#allocation3 + $0xa] sm:$0xff] }
 0x232   : > { %2017 = vmatprep.mubr.msk.f32.mxu1 %vm730_vm1, %v1037_v3  ;;  %v1027_v56 = vld [vmem:[#allocation3] sm:$0xff]  ;;  %v1028_v15 = vld [vmem:[#allocation3 + $0x8] sm:$0xff]  ;;  %v2411_v3 = vpack.c.bf16 %v1332_v2, %v1331_v1 }
 0x233   : > { %2018 = vmatmul.mubr.msk.f32.vlgmr.msra.gmra.mrb[6].mxu1 %vm730_vm1, %v1038_v55  ;;  %v1210_v18 = vld [vmem:[#allocation3 + $0x2] sm:$0xff] }
 0x234   : > { %2326 = vmatpush3.bf16.msra.mxu1 %v2323_v34  ;;  %2036 = vmatprep.mubr.msk.f32.mxu1 %vm730_vm1, %v1027_v56  ;;  %v1320_v34 = vld [vmem:[%s3243_s8 + $0x8] sm:$0xff]  ;;  %v1334_v55 = vld [vmem:[%s3243_s8 + $0x78] sm:$0xff] }
 0x235   : > { %2328 = vmatprep.subr.bf16.mxu1 %v2327_v4  ;;  %v2387_v36 = vpack.c.bf16 %v1320_v34, %v1319_v33  ;;  %v1810_v56 = vld [vmem:[%s3243_s8 + $0x108] sm:$0xff]  ;;  %v713_v33 = vadd.f32 %v2915_v51, %v1745_v31 }
 0x237   : > { %2388 = vmatprep.subr.bf16.mxu0 %v2387_v36 }
 0x238   : > { %2330 = vmatpush3.bf16.msra.mxu1 %v2327_v4  ;;  %v1333_v4 = vld [vmem:[%s3243_s8 + $0x70] sm:$0xff] }
 0x239   : > { %2332 = vmatprep.subr.bf16.mxu1 %v2331_v5  ;;  %v2415_v49 = vpack.c.bf16 %v1334_v55, %v1333_v4 }
 0x23c   : > { %2334 = vmatpush3.bf16.msra.mxu1 %v2331_v5  ;;  %v2419_v5 = vpack.c.bf16 %v1810_v56, %v1809_v53 }
 0x23d   : > { %2336 = vmatprep.subr.bf16.mxu1 %v2335_v9 }
 0x240   : > { %2338 = vmatpush3.bf16.msra.mxu1 %v2335_v9  ;;  %v2423_v9 = vpack.c.bf16 %v1812_v8, %v1811_v6 }
 0x241   : > { %2340 = vmatprep.subr.bf16.mxu1 %v2339_v35 }
 0x243   : > { %2037 = vmatmul.mubr.msk.f32.vlgmr.msra.gmra.mrb[6].mxu1 %vm730_vm1, %v1028_v15  ;;  %v1816_v15 = vld [vmem:[%s3243_s8 + $0x138] sm:$0xff] }
 0x244   : > { %2342 = vmatpush3.bf16.msra.mxu1 %v2339_v35  ;;  %2055 = vmatprep.mubr.msk.f32.mxu1 %vm730_vm1, %v1210_v18  ;;  %v1814_v35 = vld [vmem:[%s3243_s8 + $0x128] sm:$0xff] }
 0x245   : > { %2344 = vmatprep.subr.bf16.mxu1 %v2343_v14  ;;  %v2427_v13 = vpack.c.bf16 %v1814_v35, %v1813_v11  ;;  %v1818_v18 = vld [vmem:[%s3243_s8 + $0x148] sm:$0xff] }
 0x248   : > { %2346 = vmatpush3.bf16.msra.mxu1 %v2343_v14  ;;  %v1815_v14 = vld [vmem:[%s3243_s8 + $0x130] sm:$0xff] }
 0x249   : > { %2348 = vmatprep.subr.bf16.mxu1 %v2347_v19  ;;  %v2431_v16 = vpack.c.bf16 %v1816_v15, %v1815_v14 }
 0x24c   : > { %2350 = vmatpush3.bf16.msra.mxu1 %v2347_v19  ;;  %v2435_v19 = vpack.c.bf16 %v1818_v18, %v1817_v17 }
 0x24d   : > { %2352 = vmatprep.subr.bf16.mxu1 %v2351_v22 }
 0x250   : > { %2354 = vmatpush3.bf16.msra.mxu1 %v2351_v22  ;;  %v2439_v22 = vpack.c.bf16 %v1820_v21, %v1819_v20 }
 0x253   : > { %2056 = vmatmul.mubr.msk.f32.vlgmr.msra.gmra.mrb[6].mxu1 %vm730_vm1, %v1211_v23  ;;  %v1821_v23 = vld [vmem:[%s3243_s8 + $0x160] sm:$0xff] }
 0x254   : > { %v2443_v25 = vpack.c.bf16 %v1822_v24, %v1821_v23 }
 0x326   : > { %v2057_v38 = vpop.f32.mrb[6].mxu1 }
 0x327   : > { %v1312_v7 = vadd.f32 %v2057_v38, %v1792_v37  ;;  %v1293_v39 = vpop.f32.mrb[7].mxu1 }
 0x328   : > { %v1311_v40 = vadd.f32 %v1792_v37, %v1293_v39  ;;  %v712_v37 = vadd.f32 %v2908_v45, %v1745_v31 }
 0x329   : > { %v3125_v43 = vmax.f32 %v1312_v7, 0.0 }
 0x32a   : > { %v3127_v44 = vmax.f32 %v1311_v40, 0.0  ;;  %v715_v40 = vmax.f32 %v713_v33, 0.0  ;;  %v714_v42 = vmax.f32 %v712_v37, 0.0 }
 0x32b   : > { %1316 = vst [vmem:[#allocation4 + $0x9] sm:$0xff] %v3125_v43 }
 0x32c   : > { %1315 = vst [vmem:[#allocation4 + $0x1] sm:$0xff] %v3127_v44  ;;  %2090 = vmatprep.mubr.f32.mxu0 %v3127_v44 }
 0x32d   : > { %2091 = vmatmul.mubr.f32.vlgmr.msra.gmra.mrb[4].mxu0 %v3125_v43 }
 0x32e   : > { %2390 = vmatpush3.bf16.msra.mxu0 %v2387_v36 }
 0x32f   : > { %2392 = vmatprep.subr.bf16.mxu0 %v2391_v46 }
 0x332   : > { %2394 = vmatpush3.bf16.msra.mxu0 %v2391_v46  ;;  %v1505_v29 = vld [vmem:[#allocation4 + $0xa] sm:$0xff] }
 0x333   : > { %v1317_v57 = vld [vmem:[#allocation4] sm:$0xff]  ;;  %2396 = vmatprep.subr.bf16.mxu0 %v2395_v50  ;;  %v1318_v10 = vld [vmem:[#allocation4 + $0x8] sm:$0xff] }
 0x334   : > { %2125 = vmatprep.mubr.f32.mxu0 %v1317_v57  ;;  %v1504_v12 = vld [vmem:[#allocation4 + $0x2] sm:$0xff] }
 0x336   : > { %2398 = vmatpush3.bf16.msra.mxu0 %v2395_v50 }
 0x337   : > { %2400 = vmatprep.subr.bf16.mxu0 %v2399_v58 }
 0x33a   : > { %2402 = vmatpush3.bf16.msra.mxu0 %v2399_v58 }
 0x33b   : > { %2404 = vmatprep.subr.bf16.mxu0 %v2403_v61 }
 0x33e   : > { %2406 = vmatpush3.bf16.msra.mxu0 %v2403_v61 }
 0x33f   : > { %2408 = vmatprep.subr.bf16.mxu0 %v2407_v0 }
 0x342   : > { %2410 = vmatpush3.bf16.msra.mxu0 %v2407_v0 }
 0x343   : > { %2412 = vmatprep.subr.bf16.mxu0 %v2411_v3 }
 0x346   : > { %2414 = vmatpush3.bf16.msra.mxu0 %v2411_v3 }
 0x347   : > { %2416 = vmatprep.subr.bf16.mxu0 %v2415_v49 }
 0x34a   : > { %2418 = vmatpush3.bf16.msra.mxu0 %v2415_v49 }
 0x34b   : > { %2420 = vmatprep.subr.bf16.mxu0 %v2419_v5 }
 0x34d   : > { %2126 = vmatmul.mubr.f32.vlgmr.msra.gmra.mrb[4].mxu0 %v1318_v10 }
 0x34e   : > { %2422 = vmatpush3.bf16.msra.mxu0 %v2419_v5  ;;  %2160 = vmatprep.mubr.f32.mxu0 %v1504_v12 }
 0x34f   : > { %2424 = vmatprep.subr.bf16.mxu0 %v2423_v9 }
 0x352   : > { %2426 = vmatpush3.bf16.msra.mxu0 %v2423_v9 }
 0x353   : > { %2428 = vmatprep.subr.bf16.mxu0 %v2427_v13 }
 0x356   : > { %2430 = vmatpush3.bf16.msra.mxu0 %v2427_v13 }
 0x357   : > { %2432 = vmatprep.subr.bf16.mxu0 %v2431_v16 }
 0x35a   : > { %2434 = vmatpush3.bf16.msra.mxu0 %v2431_v16 }
 0x35b   : > { %2436 = vmatprep.subr.bf16.mxu0 %v2435_v19 }
 0x35e   : > { %2438 = vmatpush3.bf16.msra.mxu0 %v2435_v19 }
 0x35f   : > { %2440 = vmatprep.subr.bf16.mxu0 %v2439_v22 }
 0x362   : > { %2442 = vmatpush3.bf16.msra.mxu0 %v2439_v22 }
 0x363   : > { %2444 = vmatprep.subr.bf16.mxu0 %v2443_v25 }
 0x366   : > { %2446 = vmatpush3.bf16.msra.mxu0 %v2443_v25 }
 0x367   : > { %2448 = vmatprep.subr.bf16.mxu0 %v2447_v28 }
 0x36a   : > { %2450 = vmatpush3.bf16.msra.mxu0 %v2447_v28 }
 0x36d   : > { %2161 = vmatmul.mubr.f32.vlgmr.msra.gmra.mrb[4].mxu0 %v1505_v29 }
 0x440   : > { %v2162_v32 = vpop.f32.mrb[4].mxu0 }
 0x441   : > { %v1608_v34 = vadd.f32 %v2162_v32, %v1825_v30  ;;  %v1589_v36 = vpop.f32.mrb[5].mxu0 }
 0x442   : > { %v1607_v38 = vadd.f32 %v1825_v30, %v1589_v36 }
 0x443   : > { %v1610_v7 = vmax.f32 %v1608_v34, 0.0 }
 0x444   : > { %v1609_v39 = vmax.f32 %v1607_v38, 0.0 }
 0x445   : > { %v1612_v41 = vadd.f32 %v1610_v7, %v3125_v43 }
 0x446   : > { %v1611_v46 = vadd.f32 %v1609_v39, %v3127_v44 }
 0x447   : > { %v1614_v47 = vadd.f32 %v1612_v41, %v715_v40 }
 0x448   : > { %v1613_v51 = vadd.f32 %v1611_v46, %v714_v42 }
 0x449   : > { %1616 = vst [vmem:[%s359_s29 + $0x8] sm:$0xff] %v1614_v47 }
 0x44a   : > { %1615 = vst [vmem:[%s359_s29] sm:$0xff] %v1613_v51 }
 0x44b PF: > { %s20_s13 = sadd.s32 1, %s2486_s13  }
 0x44c   : > { %p17_p4 = scmp.ge.s32.totalorder %s20_s13, 4  }
 0x44e   :  { %19 = sbr.rel (!%p17_p4) target bundleno = 1 (0x1), region = 98 }

</bundles_post_ra>
